<compile_context>
chip_gen: v7x
topology: tpu7x:2x2x1
jax: 0.10.0
libtpu: 0.0.40
codegen_flags: <defaults>
</compile_context>

<pallas_src>
import functools

import jax
import jax.numpy as jnp
from jax import lax
from jax.experimental import pallas as pl
from jax.experimental.pallas import tpu as pltpu

LN_EPS = 1e-5
FPAD = 128          # lane-dense padding for the fused field-head projection


def _layernorm(h, gamma, beta):
    mu = jnp.mean(h, axis=-1, keepdims=True)
    var = jnp.mean((h - mu) ** 2, axis=-1, keepdims=True)
    return (h - mu) * lax.rsqrt(var + LN_EPS) * gamma + beta


# ----------------------------------------------------------------------------
# Kernel 1 (fused): attention + LN1 + hyperspherical FFN + LN2 + field heads
# Outputs: y2 (post-LN2 activations) and per-batch partial field energy.
# ----------------------------------------------------------------------------
def _fused_layer_kernel(x_ref, wqkv_ref, bqkv_ref, wo_ref, bo_ref,
                        g1_ref, be1_ref, temb_ref,
                        w1_ref, b1_ref, w2_ref, b2_ref, g2_ref, be2_ref,
                        wf1_ref, bf1_ref, wf2_ref, bf2_ref,
                        y_ref, epart_ref, *, num_heads, radius):
    f32 = jnp.float32
    bf16 = jnp.bfloat16

    x = x_ref[0]                                   # (S, D) f32
    S, D = x.shape
    dh = D // num_heads
    scale = 1.0 / (dh ** 0.5)

    # ---- fused QKV projection (bf16 MXU operands, f32 accumulate) ----------
    xb = x.astype(bf16)
    qkv = jnp.dot(xb, wqkv_ref[...], preferred_element_type=f32) + bqkv_ref[...]

    # ---- multi-head attention; output projection folded into the head loop
    #      (no lane-concat of narrow (S, dh) slices).
    # TODO(synk): attention mask path not implemented (mask=None in example).
    attn = jnp.zeros((S, D), f32)
    for h in range(num_heads):                     # static, small
        qh = qkv[:, h * dh:(h + 1) * dh].astype(bf16)
        kh = qkv[:, D + h * dh:D + (h + 1) * dh].astype(bf16)
        vh = qkv[:, 2 * D + h * dh:2 * D + (h + 1) * dh].astype(bf16)
        s = lax.dot_general(qh, kh, (((1,), (1,)), ((), ())),
                            preferred_element_type=f32) * scale      # (S, S)
        s = s - jnp.max(s, axis=-1, keepdims=True)
        p = jnp.exp(s)
        p = p * pl.reciprocal(jnp.sum(p, axis=-1, keepdims=True), approx=True)
        oh = jnp.dot(p.astype(bf16), vh, preferred_element_type=f32)  # (S, dh)
        attn = attn + jnp.dot(oh.astype(bf16),
                              wo_ref[h * dh:(h + 1) * dh, :],
                              preferred_element_type=f32)             # (S, D)
    attn = attn + bo_ref[...]

    y1 = _layernorm(x + attn, g1_ref[...], be1_ref[...])

    # ---- hyperspherical FFN (time emb + 2-layer MLP + project onto sphere) --
    xin = (y1 + temb_ref[...]).astype(bf16)
    h1 = jnp.maximum(
        jnp.dot(xin, w1_ref[...], preferred_element_type=f32) + b1_ref[...], 0.0)
    f = jnp.dot(h1.astype(bf16), w2_ref[...],
                preferred_element_type=f32) + b2_ref[...]
    f = f * (radius * lax.rsqrt(jnp.sum(f * f, axis=-1, keepdims=True) + 1e-12))

    y2 = _layernorm(y1 + f, g2_ref[...], be2_ref[...])
    y_ref[0] = y2

    # ---- fused vector/scalar field heads (lane-dense padded projections) ---
    hf = jnp.maximum(
        jnp.dot(y2.astype(bf16), wf1_ref[...],
                preferred_element_type=f32) + bf1_ref[...], 0.0)       # (S, 2D)
    field = jnp.dot(hf.astype(bf16), wf2_ref[...],
                    preferred_element_type=f32) + bf2_ref[...]          # (S, FPAD)
    ve = jnp.sqrt(jnp.sum(field[:, 0:3] ** 2, axis=-1, keepdims=True))  # (S, 1)
    se = jnp.abs(field[:, 3:4])                                         # (S, 1)
    epart_ref[0] = jnp.sum(ve + se, axis=0, keepdims=True)              # (1, 1)


# ----------------------------------------------------------------------------
# Kernel 2: energy gating + (conditional) adaptive noise + efficiency mode
# Noise is generated on-chip with the TPU PRNG (no HBM noise stream).
# ----------------------------------------------------------------------------
def _finalize_prng_kernel(e_ref, seed_ref, x_ref, o_ref, *, radius, noise_factor):
    x = x_ref[0]                                   # (ts, D) f32
    e = e_ref[0, 0]                                # scalar (SMEM)
    gate = jax.nn.sigmoid(e / radius)
    xs = x * gate
    # adaptive-noise + efficiency branch (selected iff mean energy < radius/2)
    pltpu.prng_seed(seed_ref[0]
                    + pl.program_id(0) * pl.num_programs(1) + pl.program_id(1))
    noise = pltpu.stateful_normal(x.shape, jnp.float32)
    ns = noise_factor * jnp.exp(-e / radius)
    xn = xs + ns * noise
    xe = xn + jnp.maximum(jnp.mean(xn, axis=-1, keepdims=True), 0.0)
    o_ref[0] = jnp.where(e < radius * 0.5, xe, xs)


def _finalize_noise_kernel(e_ref, x_ref, n_ref, o_ref, *, radius, noise_factor):
    # Fallback path: noise streamed from HBM (used only if on-chip PRNG
    # sampling is unavailable in the installed jax build).
    x = x_ref[0]
    e = e_ref[0, 0]
    gate = jax.nn.sigmoid(e / radius)
    xs = x * gate
    ns = noise_factor * jnp.exp(-e / radius)
    xn = xs + ns * n_ref[0]
    xe = xn + jnp.maximum(jnp.mean(xn, axis=-1, keepdims=True), 0.0)
    o_ref[0] = jnp.where(e < radius * 0.5, xe, xs)


# ----------------------------------------------------------------------------
# Parameter preprocessing: bf16 weights, fused QKV and fused field heads.
# ----------------------------------------------------------------------------
def prepare_params(params):
    bf16 = jnp.bfloat16
    D = params["wq"].shape[0]
    prep = {}
    prep["wqkv"] = jnp.concatenate(
        [params["wq"], params["wk"], params["wv"]], axis=1).astype(bf16)
    prep["bqkv"] = jnp.concatenate(
        [params["bq"], params["bk"], params["bv"]], axis=1)
    prep["wo"] = params["wo"].astype(bf16)
    prep["bo"] = params["bo"]
    prep["ln1_g"], prep["ln1_b"] = params["ln1_g"], params["ln1_b"]
    prep["ffn_w1"] = params["ffn_w1"].astype(bf16)
    prep["ffn_b1"] = params["ffn_b1"]
    prep["ffn_w2"] = params["ffn_w2"].astype(bf16)
    prep["ffn_b2"] = params["ffn_b2"]
    prep["ln2_g"], prep["ln2_b"] = params["ln2_g"], params["ln2_b"]
    # fused field heads: hidden = [vector | scalar], second proj block-diagonal
    # into a 128-wide (lane-dense) padded output: cols 0..2 = vector, col 3 = scalar
    prep["wf1"] = jnp.concatenate(
        [params["vf_w1"], params["sf_w1"]], axis=1).astype(bf16)        # (D, 2D)
    prep["bf1"] = jnp.concatenate([params["vf_b1"], params["sf_b1"]], axis=1)
    wf2 = jnp.zeros((2 * D, FPAD), jnp.float32)
    wf2 = wf2.at[:D, 0:3].set(params["vf_w2"])
    wf2 = wf2.at[D:, 3:4].set(params["sf_w2"])
    prep["wf2"] = wf2.astype(bf16)
    bf2 = jnp.zeros((1, FPAD), jnp.float32)
    bf2 = bf2.at[0, 0:3].set(params["vf_b2"][0])
    bf2 = bf2.at[0, 3:4].set(params["sf_b2"][0])
    prep["bf2"] = bf2
    prep["time_emb"] = params["time_emb"]
    return prep


# ----------------------------------------------------------------------------
# Wrapper
# ----------------------------------------------------------------------------
def dynamic_layer_forward(prep, x, time_step=0, *, seed=0,
                          num_heads=8, radius=1.0, noise_factor=0.1):
    B, S, D = x.shape
    f32 = jnp.float32

    xspec = pl.BlockSpec((1, S, D), lambda b: (b, 0, 0))
    rep = lambda a: pl.BlockSpec(a.shape, lambda b: (0,) * a.ndim)

    temb = prep["time_emb"][time_step][None, :]            # (1, D), static index

    # --- fused attention + LN1 + FFN + LN2 + field-energy partials ----------
    y2, eparts = pl.pallas_call(
        functools.partial(_fused_layer_kernel, num_heads=num_heads, radius=radius),
        out_shape=(jax.ShapeDtypeStruct((B, S, D), f32),
                   jax.ShapeDtypeStruct((B, 1, 1), f32)),
        grid=(B,),
        in_specs=[xspec,
                  rep(prep["wqkv"]), rep(prep["bqkv"]),
                  rep(prep["wo"]), rep(prep["bo"]),
                  rep(prep["ln1_g"]), rep(prep["ln1_b"]),
                  rep(temb),
                  rep(prep["ffn_w1"]), rep(prep["ffn_b1"]),
                  rep(prep["ffn_w2"]), rep(prep["ffn_b2"]),
                  rep(prep["ln2_g"]), rep(prep["ln2_b"]),
                  rep(prep["wf1"]), rep(prep["bf1"]),
                  rep(prep["wf2"]), rep(prep["bf2"])],
        out_specs=(xspec, pl.BlockSpec((1, 1, 1), lambda b: (b, 0, 0))),
        compiler_params=pltpu.CompilerParams(dimension_semantics=("parallel",)),
    )(x, prep["wqkv"], prep["bqkv"], prep["wo"], prep["bo"],
      prep["ln1_g"], prep["ln1_b"], temb,
      prep["ffn_w1"], prep["ffn_b1"], prep["ffn_w2"], prep["ffn_b2"],
      prep["ln2_g"], prep["ln2_b"],
      prep["wf1"], prep["bf1"], prep["wf2"], prep["bf2"])

    field_energy = jnp.sum(eparts) / (B * S)               # scalar mean energy

    # --- energy gating + conditional noise / efficiency mode ----------------
    energy_arr = field_energy.reshape(1, 1).astype(f32)
    seed_arr = jnp.asarray([seed], jnp.int32)

    ts = 128 if (S % 128 == 0) else S                      # seq tile for pipeline depth
    n_t = S // ts
    xspec2 = pl.BlockSpec((1, ts, D), lambda b, t: (b, t, 0))
    smem = pl.BlockSpec(memory_space=pltpu.MemorySpace.SMEM)
    common = dict(
        out_shape=jax.ShapeDtypeStruct((B, S, D), f32),
        grid=(B, n_t),
        out_specs=xspec2,
        compiler_params=pltpu.CompilerParams(
            dimension_semantics=("parallel", "parallel")),
    )
    try:
        x_out = pl.pallas_call(
            functools.partial(_finalize_prng_kernel,
                              radius=radius, noise_factor=noise_factor),
            in_specs=[smem, smem, xspec2],
            **common,
        )(energy_arr, seed_arr, y2)
        jax.block_until_ready(x_out)
    except Exception:
        # TODO(synk): on-chip PRNG sampling unavailable in this jax build;
        # fall back to streaming the noise tensor from HBM.
        noise = jax.random.normal(jax.random.PRNGKey(seed), (B, S, D), f32)
        x_out = pl.pallas_call(
            functools.partial(_finalize_noise_kernel,
                              radius=radius, noise_factor=noise_factor),
            in_specs=[smem, xspec2, xspec2],
            **common,
        )(energy_arr, y2, noise)

    return x_out, field_energy


# ----------------------------------------------------------------------------
# Deterministic parameter init (synthetic, no checkpoint)
# ----------------------------------------------------------------------------
def init_params(key, d_model, d_ff, timesteps=10):
    ks = jax.random.split(key, 11)

    def lin(k, din, dout):
        w = 0.05 * jax.random.normal(k, (din, dout), jnp.float32)
        b = jnp.zeros((1, dout), jnp.float32)
        return w, b

    wq, bq = lin(ks[0], d_model, d_model)
    wk, bk = lin(ks[1], d_model, d_model)
    wv, bv = lin(ks[2], d_model, d_model)
    wo, bo = lin(ks[3], d_model, d_model)
    w1, b1 = lin(ks[4], d_model, d_ff)
    w2, b2 = lin(ks[5], d_ff, d_model)
    vf_w1, vf_b1 = lin(ks[6], d_model, d_model)
    vf_w2, vf_b2 = lin(ks[7], d_model, 3)
    sf_w1, sf_b1 = lin(ks[8], d_model, d_model)
    sf_w2, sf_b2 = lin(ks[9], d_model, 1)
    time_emb = 0.05 * jax.random.normal(ks[10], (timesteps, d_model), jnp.float32)

    ones = jnp.ones((1, d_model), jnp.float32)
    zeros = jnp.zeros((1, d_model), jnp.float32)
    return dict(
        wq=wq, bq=bq, wk=wk, bk=bk, wv=wv, bv=bv, wo=wo, bo=bo,
        ffn_w1=w1, ffn_b1=b1, ffn_w2=w2, ffn_b2=b2,
        vf_w1=vf_w1, vf_b1=vf_b1, vf_w2=vf_w2, vf_b2=vf_b2,
        sf_w1=sf_w1, sf_b1=sf_b1, sf_w2=sf_w2, sf_b2=sf_b2,
        ln1_g=ones, ln1_b=zeros, ln2_g=ones, ln2_b=zeros,
        time_emb=time_emb)


if __name__ == "__main__":
    B, S, D, D_FF, H = 2, 8, 32, 64, 8

    root = jax.random.PRNGKey(0)
    kp, kx = jax.random.split(root, 2)
    params = init_params(kp, D, D_FF, timesteps=10)
    prep = prepare_params(params)
    x = jax.random.normal(kx, (B, S, D), jnp.float32)

    x_out, field_energy = dynamic_layer_forward(
        prep, x, time_step=0, seed=0,
        num_heads=H, radius=1.0, noise_factor=0.1)
    jax.block_until_ready((x_out, field_energy))

    assert x_out.shape == (B, S, D)
    assert field_energy.shape == ()
    print("KERNEL_OK")
</pallas_src>

<mosaic_0001>
module attributes {stable_mosaic.version = 11 : i64} {
  func.func @_fused_layer_kernel(%arg0: i32, %arg1: memref<1x8x32xf32, #tpu.memory_space<vmem>>, %arg2: memref<32x96xbf16, #tpu.memory_space<vmem>>, %arg3: memref<1x96xf32, #tpu.memory_space<vmem>>, %arg4: memref<32x32xbf16, #tpu.memory_space<vmem>>, %arg5: memref<1x32xf32, #tpu.memory_space<vmem>>, %arg6: memref<1x32xf32, #tpu.memory_space<vmem>>, %arg7: memref<1x32xf32, #tpu.memory_space<vmem>>, %arg8: memref<1x32xf32, #tpu.memory_space<vmem>>, %arg9: memref<32x64xbf16, #tpu.memory_space<vmem>>, %arg10: memref<1x64xf32, #tpu.memory_space<vmem>>, %arg11: memref<64x32xbf16, #tpu.memory_space<vmem>>, %arg12: memref<1x32xf32, #tpu.memory_space<vmem>>, %arg13: memref<1x32xf32, #tpu.memory_space<vmem>>, %arg14: memref<1x32xf32, #tpu.memory_space<vmem>>, %arg15: memref<32x64xbf16, #tpu.memory_space<vmem>>, %arg16: memref<1x64xf32, #tpu.memory_space<vmem>>, %arg17: memref<64x128xbf16, #tpu.memory_space<vmem>>, %arg18: memref<1x128xf32, #tpu.memory_space<vmem>>, %arg19: memref<1x8x32xf32, #tpu.memory_space<vmem>>, %arg20: memref<1x1x1xf32, #tpu.memory_space<vmem>>) attributes {dimension_semantics = [#tpu.dimension_semantics<parallel>], iteration_bounds = array<i64: 2>, scalar_prefetch = 0 : i64, scratch_operands = 0 : i64, tpu.core_type = #tpu.core_type<tc>, window_params = [{transform_indices = @transform_0, window_bounds = array<i64: 1, 8, 32>}, {pipeline_mode = #tpu.pipeline_mode<synchronous>, transform_indices = @transform_1, window_bounds = array<i64: 32, 96>}, {pipeline_mode = #tpu.pipeline_mode<synchronous>, transform_indices = @transform_2, window_bounds = array<i64: 1, 96>}, {pipeline_mode = #tpu.pipeline_mode<synchronous>, transform_indices = @transform_3, window_bounds = array<i64: 32, 32>}, {pipeline_mode = #tpu.pipeline_mode<synchronous>, transform_indices = @transform_4, window_bounds = array<i64: 1, 32>}, {pipeline_mode = #tpu.pipeline_mode<synchronous>, transform_indices = @transform_5, window_bounds = array<i64: 1, 32>}, {pipeline_mode = #tpu.pipeline_mode<synchronous>, transform_indices = @transform_6, window_bounds = array<i64: 1, 32>}, {pipeline_mode = #tpu.pipeline_mode<synchronous>, transform_indices = @transform_7, window_bounds = array<i64: 1, 32>}, {pipeline_mode = #tpu.pipeline_mode<synchronous>, transform_indices = @transform_8, window_bounds = array<i64: 32, 64>}, {pipeline_mode = #tpu.pipeline_mode<synchronous>, transform_indices = @transform_9, window_bounds = array<i64: 1, 64>}, {pipeline_mode = #tpu.pipeline_mode<synchronous>, transform_indices = @transform_10, window_bounds = array<i64: 64, 32>}, {pipeline_mode = #tpu.pipeline_mode<synchronous>, transform_indices = @transform_11, window_bounds = array<i64: 1, 32>}, {pipeline_mode = #tpu.pipeline_mode<synchronous>, transform_indices = @transform_12, window_bounds = array<i64: 1, 32>}, {pipeline_mode = #tpu.pipeline_mode<synchronous>, transform_indices = @transform_13, window_bounds = array<i64: 1, 32>}, {pipeline_mode = #tpu.pipeline_mode<synchronous>, transform_indices = @transform_14, window_bounds = array<i64: 32, 64>}, {pipeline_mode = #tpu.pipeline_mode<synchronous>, transform_indices = @transform_15, window_bounds = array<i64: 1, 64>}, {pipeline_mode = #tpu.pipeline_mode<synchronous>, transform_indices = @transform_16, window_bounds = array<i64: 64, 128>}, {pipeline_mode = #tpu.pipeline_mode<synchronous>, transform_indices = @transform_17, window_bounds = array<i64: 1, 128>}, {transform_indices = @transform_18, window_bounds = array<i64: 1, 8, 32>}, {transform_indices = @transform_19, window_bounds = array<i64: 1, 1, 1>}]} {
    %c0 = arith.constant 0 : index
    %c0_0 = arith.constant 0 : index
    %c0_1 = arith.constant 0 : index
    %0 = vector.load %arg1[%c0, %c0_0, %c0_1] : memref<1x8x32xf32, #tpu.memory_space<vmem>>, vector<1x8x32xf32>
    %1 = vector.shape_cast %0 : vector<1x8x32xf32> to vector<8x32xf32>
    %2 = arith.truncf %1 : vector<8x32xf32> to vector<8x32xbf16>
    %c0_2 = arith.constant 0 : index
    %c0_3 = arith.constant 0 : index
    %3 = vector.load %arg2[%c0_2, %c0_3] : memref<32x96xbf16, #tpu.memory_space<vmem>>, vector<32x96xbf16>
    %cst = arith.constant dense<0.000000e+00> : vector<8x96xf32>
    %4 = tpu.matmul %2, %3, %cst {dimension_numbers = #tpu.dot_dimension_numbers<[1], [0], [0], [1], [0, 0, 1, 1], [], []>} : vector<8x32xbf16>, vector<32x96xbf16>, vector<8x96xf32> -> vector<8x96xf32>
    %c0_4 = arith.constant 0 : index
    %c0_5 = arith.constant 0 : index
    %5 = vector.load %arg3[%c0_4, %c0_5] : memref<1x96xf32, #tpu.memory_space<vmem>>, vector<1x96xf32>
    %6 = vector.broadcast %5 : vector<1x96xf32> to vector<8x96xf32>
    %7 = arith.addf %4, %6 : vector<8x96xf32>
    %cst_6 = arith.constant 0.000000e+00 : f32
    %8 = vector.broadcast %cst_6 : f32 to vector<8x32xf32>
    %9 = vector.extract_strided_slice %7 {offsets = [0, 0], sizes = [8, 4], strides = [1, 1]} : vector<8x96xf32> to vector<8x4xf32>
    %10 = arith.truncf %9 : vector<8x4xf32> to vector<8x4xbf16>
    %11 = vector.extract_strided_slice %7 {offsets = [0, 32], sizes = [8, 4], strides = [1, 1]} : vector<8x96xf32> to vector<8x4xf32>
    %12 = arith.truncf %11 : vector<8x4xf32> to vector<8x4xbf16>
    %13 = vector.extract_strided_slice %7 {offsets = [0, 64], sizes = [8, 4], strides = [1, 1]} : vector<8x96xf32> to vector<8x4xf32>
    %14 = arith.truncf %13 : vector<8x4xf32> to vector<8x4xbf16>
    %cst_7 = arith.constant dense<0.000000e+00> : vector<8x8xf32>
    %15 = tpu.matmul %10, %12, %cst_7 {dimension_numbers = #tpu.dot_dimension_numbers<[1], [1], [0], [0], [0, 0, 1, 0], [], []>} : vector<8x4xbf16>, vector<8x4xbf16>, vector<8x8xf32> -> vector<8x8xf32>
    %cst_8 = arith.constant 5.000000e-01 : f32
    %16 = vector.broadcast %cst_8 : f32 to vector<8x8xf32>
    %17 = arith.mulf %15, %16 : vector<8x8xf32>
    %cst_9 = arith.constant dense<0xFF800000> : vector<8xf32>
    %18 = vector.multi_reduction <maximumf>, %17, %cst_9 [1] : vector<8x8xf32> to vector<8xf32>
    %19 = vector.shape_cast %18 : vector<8xf32> to vector<8x1xf32>
    %20 = vector.broadcast %19 : vector<8x1xf32> to vector<8x8xf32>
    %21 = arith.subf %17, %20 : vector<8x8xf32>
    %22 = math.exp %21 : vector<8x8xf32>
    %cst_10 = arith.constant dense<0.000000e+00> : vector<8xf32>
    %23 = vector.multi_reduction <add>, %22, %cst_10 [1] : vector<8x8xf32> to vector<8xf32>
    %24 = vector.shape_cast %23 : vector<8xf32> to vector<8x1xf32>
    %25 = tpu.reciprocal %24 {approx = true} : vector<8x1xf32> -> vector<8x1xf32>
    %26 = vector.broadcast %25 : vector<8x1xf32> to vector<8x8xf32>
    %27 = arith.mulf %22, %26 : vector<8x8xf32>
    %28 = arith.truncf %27 : vector<8x8xf32> to vector<8x8xbf16>
    %cst_11 = arith.constant dense<0.000000e+00> : vector<8x4xf32>
    %29 = tpu.matmul %28, %14, %cst_11 {dimension_numbers = #tpu.dot_dimension_numbers<[1], [0], [0], [1], [0, 0, 1, 1], [], []>} : vector<8x8xbf16>, vector<8x4xbf16>, vector<8x4xf32> -> vector<8x4xf32>
    %30 = arith.truncf %29 : vector<8x4xf32> to vector<8x4xbf16>
    %c0_12 = arith.constant 0 : index
    %c0_13 = arith.constant 0 : index
    %31 = vector.load %arg4[%c0_12, %c0_13] : memref<32x32xbf16, #tpu.memory_space<vmem>>, vector<4x32xbf16>
    %cst_14 = arith.constant dense<0.000000e+00> : vector<8x32xf32>
    %32 = tpu.matmul %30, %31, %cst_14 {dimension_numbers = #tpu.dot_dimension_numbers<[1], [0], [0], [1], [0, 0, 1, 1], [], []>} : vector<8x4xbf16>, vector<4x32xbf16>, vector<8x32xf32> -> vector<8x32xf32>
    %33 = arith.addf %8, %32 : vector<8x32xf32>
    %34 = vector.extract_strided_slice %7 {offsets = [0, 4], sizes = [8, 4], strides = [1, 1]} : vector<8x96xf32> to vector<8x4xf32>
    %35 = arith.truncf %34 : vector<8x4xf32> to vector<8x4xbf16>
    %36 = vector.extract_strided_slice %7 {offsets = [0, 36], sizes = [8, 4], strides = [1, 1]} : vector<8x96xf32> to vector<8x4xf32>
    %37 = arith.truncf %36 : vector<8x4xf32> to vector<8x4xbf16>
    %38 = vector.extract_strided_slice %7 {offsets = [0, 68], sizes = [8, 4], strides = [1, 1]} : vector<8x96xf32> to vector<8x4xf32>
    %39 = arith.truncf %38 : vector<8x4xf32> to vector<8x4xbf16>
    %cst_15 = arith.constant dense<0.000000e+00> : vector<8x8xf32>
    %40 = tpu.matmul %35, %37, %cst_15 {dimension_numbers = #tpu.dot_dimension_numbers<[1], [1], [0], [0], [0, 0, 1, 0], [], []>} : vector<8x4xbf16>, vector<8x4xbf16>, vector<8x8xf32> -> vector<8x8xf32>
    %cst_16 = arith.constant 5.000000e-01 : f32
    %41 = vector.broadcast %cst_16 : f32 to vector<8x8xf32>
    %42 = arith.mulf %40, %41 : vector<8x8xf32>
    %cst_17 = arith.constant dense<0xFF800000> : vector<8xf32>
    %43 = vector.multi_reduction <maximumf>, %42, %cst_17 [1] : vector<8x8xf32> to vector<8xf32>
    %44 = vector.shape_cast %43 : vector<8xf32> to vector<8x1xf32>
    %45 = vector.broadcast %44 : vector<8x1xf32> to vector<8x8xf32>
    %46 = arith.subf %42, %45 : vector<8x8xf32>
    %47 = math.exp %46 : vector<8x8xf32>
    %cst_18 = arith.constant dense<0.000000e+00> : vector<8xf32>
    %48 = vector.multi_reduction <add>, %47, %cst_18 [1] : vector<8x8xf32> to vector<8xf32>
    %49 = vector.shape_cast %48 : vector<8xf32> to vector<8x1xf32>
    %50 = tpu.reciprocal %49 {approx = true} : vector<8x1xf32> -> vector<8x1xf32>
    %51 = vector.broadcast %50 : vector<8x1xf32> to vector<8x8xf32>
    %52 = arith.mulf %47, %51 : vector<8x8xf32>
    %53 = arith.truncf %52 : vector<8x8xf32> to vector<8x8xbf16>
    %cst_19 = arith.constant dense<0.000000e+00> : vector<8x4xf32>
    %54 = tpu.matmul %53, %39, %cst_19 {dimension_numbers = #tpu.dot_dimension_numbers<[1], [0], [0], [1], [0, 0, 1, 1], [], []>} : vector<8x8xbf16>, vector<8x4xbf16>, vector<8x4xf32> -> vector<8x4xf32>
    %55 = arith.truncf %54 : vector<8x4xf32> to vector<8x4xbf16>
    %c4 = arith.constant 4 : index
    %c0_20 = arith.constant 0 : index
    %56 = vector.load %arg4[%c4, %c0_20] : memref<32x32xbf16, #tpu.memory_space<vmem>>, vector<4x32xbf16>
    %cst_21 = arith.constant dense<0.000000e+00> : vector<8x32xf32>
    %57 = tpu.matmul %55, %56, %cst_21 {dimension_numbers = #tpu.dot_dimension_numbers<[1], [0], [0], [1], [0, 0, 1, 1], [], []>} : vector<8x4xbf16>, vector<4x32xbf16>, vector<8x32xf32> -> vector<8x32xf32>
    %58 = arith.addf %33, %57 : vector<8x32xf32>
    %59 = vector.extract_strided_slice %7 {offsets = [0, 8], sizes = [8, 4], strides = [1, 1]} : vector<8x96xf32> to vector<8x4xf32>
    %60 = arith.truncf %59 : vector<8x4xf32> to vector<8x4xbf16>
    %61 = vector.extract_strided_slice %7 {offsets = [0, 40], sizes = [8, 4], strides = [1, 1]} : vector<8x96xf32> to vector<8x4xf32>
    %62 = arith.truncf %61 : vector<8x4xf32> to vector<8x4xbf16>
    %63 = vector.extract_strided_slice %7 {offsets = [0, 72], sizes = [8, 4], strides = [1, 1]} : vector<8x96xf32> to vector<8x4xf32>
    %64 = arith.truncf %63 : vector<8x4xf32> to vector<8x4xbf16>
    %cst_22 = arith.constant dense<0.000000e+00> : vector<8x8xf32>
    %65 = tpu.matmul %60, %62, %cst_22 {dimension_numbers = #tpu.dot_dimension_numbers<[1], [1], [0], [0], [0, 0, 1, 0], [], []>} : vector<8x4xbf16>, vector<8x4xbf16>, vector<8x8xf32> -> vector<8x8xf32>
    %cst_23 = arith.constant 5.000000e-01 : f32
    %66 = vector.broadcast %cst_23 : f32 to vector<8x8xf32>
    %67 = arith.mulf %65, %66 : vector<8x8xf32>
    %cst_24 = arith.constant dense<0xFF800000> : vector<8xf32>
    %68 = vector.multi_reduction <maximumf>, %67, %cst_24 [1] : vector<8x8xf32> to vector<8xf32>
    %69 = vector.shape_cast %68 : vector<8xf32> to vector<8x1xf32>
    %70 = vector.broadcast %69 : vector<8x1xf32> to vector<8x8xf32>
    %71 = arith.subf %67, %70 : vector<8x8xf32>
    %72 = math.exp %71 : vector<8x8xf32>
    %cst_25 = arith.constant dense<0.000000e+00> : vector<8xf32>
    %73 = vector.multi_reduction <add>, %72, %cst_25 [1] : vector<8x8xf32> to vector<8xf32>
    %74 = vector.shape_cast %73 : vector<8xf32> to vector<8x1xf32>
    %75 = tpu.reciprocal %74 {approx = true} : vector<8x1xf32> -> vector<8x1xf32>
    %76 = vector.broadcast %75 : vector<8x1xf32> to vector<8x8xf32>
    %77 = arith.mulf %72, %76 : vector<8x8xf32>
    %78 = arith.truncf %77 : vector<8x8xf32> to vector<8x8xbf16>
    %cst_26 = arith.constant dense<0.000000e+00> : vector<8x4xf32>
    %79 = tpu.matmul %78, %64, %cst_26 {dimension_numbers = #tpu.dot_dimension_numbers<[1], [0], [0], [1], [0, 0, 1, 1], [], []>} : vector<8x8xbf16>, vector<8x4xbf16>, vector<8x4xf32> -> vector<8x4xf32>
    %80 = arith.truncf %79 : vector<8x4xf32> to vector<8x4xbf16>
    %c8 = arith.constant 8 : index
    %c0_27 = arith.constant 0 : index
    %81 = vector.load %arg4[%c8, %c0_27] : memref<32x32xbf16, #tpu.memory_space<vmem>>, vector<4x32xbf16>
    %cst_28 = arith.constant dense<0.000000e+00> : vector<8x32xf32>
    %82 = tpu.matmul %80, %81, %cst_28 {dimension_numbers = #tpu.dot_dimension_numbers<[1], [0], [0], [1], [0, 0, 1, 1], [], []>} : vector<8x4xbf16>, vector<4x32xbf16>, vector<8x32xf32> -> vector<8x32xf32>
    %83 = arith.addf %58, %82 : vector<8x32xf32>
    %84 = vector.extract_strided_slice %7 {offsets = [0, 12], sizes = [8, 4], strides = [1, 1]} : vector<8x96xf32> to vector<8x4xf32>
    %85 = arith.truncf %84 : vector<8x4xf32> to vector<8x4xbf16>
    %86 = vector.extract_strided_slice %7 {offsets = [0, 44], sizes = [8, 4], strides = [1, 1]} : vector<8x96xf32> to vector<8x4xf32>
    %87 = arith.truncf %86 : vector<8x4xf32> to vector<8x4xbf16>
    %88 = vector.extract_strided_slice %7 {offsets = [0, 76], sizes = [8, 4], strides = [1, 1]} : vector<8x96xf32> to vector<8x4xf32>
    %89 = arith.truncf %88 : vector<8x4xf32> to vector<8x4xbf16>
    %cst_29 = arith.constant dense<0.000000e+00> : vector<8x8xf32>
    %90 = tpu.matmul %85, %87, %cst_29 {dimension_numbers = #tpu.dot_dimension_numbers<[1], [1], [0], [0], [0, 0, 1, 0], [], []>} : vector<8x4xbf16>, vector<8x4xbf16>, vector<8x8xf32> -> vector<8x8xf32>
    %cst_30 = arith.constant 5.000000e-01 : f32
    %91 = vector.broadcast %cst_30 : f32 to vector<8x8xf32>
    %92 = arith.mulf %90, %91 : vector<8x8xf32>
    %cst_31 = arith.constant dense<0xFF800000> : vector<8xf32>
    %93 = vector.multi_reduction <maximumf>, %92, %cst_31 [1] : vector<8x8xf32> to vector<8xf32>
    %94 = vector.shape_cast %93 : vector<8xf32> to vector<8x1xf32>
    %95 = vector.broadcast %94 : vector<8x1xf32> to vector<8x8xf32>
    %96 = arith.subf %92, %95 : vector<8x8xf32>
    %97 = math.exp %96 : vector<8x8xf32>
    %cst_32 = arith.constant dense<0.000000e+00> : vector<8xf32>
    %98 = vector.multi_reduction <add>, %97, %cst_32 [1] : vector<8x8xf32> to vector<8xf32>
    %99 = vector.shape_cast %98 : vector<8xf32> to vector<8x1xf32>
    %100 = tpu.reciprocal %99 {approx = true} : vector<8x1xf32> -> vector<8x1xf32>
    %101 = vector.broadcast %100 : vector<8x1xf32> to vector<8x8xf32>
    %102 = arith.mulf %97, %101 : vector<8x8xf32>
    %103 = arith.truncf %102 : vector<8x8xf32> to vector<8x8xbf16>
    %cst_33 = arith.constant dense<0.000000e+00> : vector<8x4xf32>
    %104 = tpu.matmul %103, %89, %cst_33 {dimension_numbers = #tpu.dot_dimension_numbers<[1], [0], [0], [1], [0, 0, 1, 1], [], []>} : vector<8x8xbf16>, vector<8x4xbf16>, vector<8x4xf32> -> vector<8x4xf32>
    %105 = arith.truncf %104 : vector<8x4xf32> to vector<8x4xbf16>
    %c12 = arith.constant 12 : index
    %c0_34 = arith.constant 0 : index
    %106 = vector.load %arg4[%c12, %c0_34] : memref<32x32xbf16, #tpu.memory_space<vmem>>, vector<4x32xbf16>
    %cst_35 = arith.constant dense<0.000000e+00> : vector<8x32xf32>
    %107 = tpu.matmul %105, %106, %cst_35 {dimension_numbers = #tpu.dot_dimension_numbers<[1], [0], [0], [1], [0, 0, 1, 1], [], []>} : vector<8x4xbf16>, vector<4x32xbf16>, vector<8x32xf32> -> vector<8x32xf32>
    %108 = arith.addf %83, %107 : vector<8x32xf32>
    %109 = vector.extract_strided_slice %7 {offsets = [0, 16], sizes = [8, 4], strides = [1, 1]} : vector<8x96xf32> to vector<8x4xf32>
    %110 = arith.truncf %109 : vector<8x4xf32> to vector<8x4xbf16>
    %111 = vector.extract_strided_slice %7 {offsets = [0, 48], sizes = [8, 4], strides = [1, 1]} : vector<8x96xf32> to vector<8x4xf32>
    %112 = arith.truncf %111 : vector<8x4xf32> to vector<8x4xbf16>
    %113 = vector.extract_strided_slice %7 {offsets = [0, 80], sizes = [8, 4], strides = [1, 1]} : vector<8x96xf32> to vector<8x4xf32>
    %114 = arith.truncf %113 : vector<8x4xf32> to vector<8x4xbf16>
    %cst_36 = arith.constant dense<0.000000e+00> : vector<8x8xf32>
    %115 = tpu.matmul %110, %112, %cst_36 {dimension_numbers = #tpu.dot_dimension_numbers<[1], [1], [0], [0], [0, 0, 1, 0], [], []>} : vector<8x4xbf16>, vector<8x4xbf16>, vector<8x8xf32> -> vector<8x8xf32>
    %cst_37 = arith.constant 5.000000e-01 : f32
    %116 = vector.broadcast %cst_37 : f32 to vector<8x8xf32>
    %117 = arith.mulf %115, %116 : vector<8x8xf32>
    %cst_38 = arith.constant dense<0xFF800000> : vector<8xf32>
    %118 = vector.multi_reduction <maximumf>, %117, %cst_38 [1] : vector<8x8xf32> to vector<8xf32>
    %119 = vector.shape_cast %118 : vector<8xf32> to vector<8x1xf32>
    %120 = vector.broadcast %119 : vector<8x1xf32> to vector<8x8xf32>
    %121 = arith.subf %117, %120 : vector<8x8xf32>
    %122 = math.exp %121 : vector<8x8xf32>
    %cst_39 = arith.constant dense<0.000000e+00> : vector<8xf32>
    %123 = vector.multi_reduction <add>, %122, %cst_39 [1] : vector<8x8xf32> to vector<8xf32>
    %124 = vector.shape_cast %123 : vector<8xf32> to vector<8x1xf32>
    %125 = tpu.reciprocal %124 {approx = true} : vector<8x1xf32> -> vector<8x1xf32>
    %126 = vector.broadcast %125 : vector<8x1xf32> to vector<8x8xf32>
    %127 = arith.mulf %122, %126 : vector<8x8xf32>
    %128 = arith.truncf %127 : vector<8x8xf32> to vector<8x8xbf16>
    %cst_40 = arith.constant dense<0.000000e+00> : vector<8x4xf32>
    %129 = tpu.matmul %128, %114, %cst_40 {dimension_numbers = #tpu.dot_dimension_numbers<[1], [0], [0], [1], [0, 0, 1, 1], [], []>} : vector<8x8xbf16>, vector<8x4xbf16>, vector<8x4xf32> -> vector<8x4xf32>
    %130 = arith.truncf %129 : vector<8x4xf32> to vector<8x4xbf16>
    %c16 = arith.constant 16 : index
    %c0_41 = arith.constant 0 : index
    %131 = vector.load %arg4[%c16, %c0_41] : memref<32x32xbf16, #tpu.memory_space<vmem>>, vector<4x32xbf16>
    %cst_42 = arith.constant dense<0.000000e+00> : vector<8x32xf32>
    %132 = tpu.matmul %130, %131, %cst_42 {dimension_numbers = #tpu.dot_dimension_numbers<[1], [0], [0], [1], [0, 0, 1, 1], [], []>} : vector<8x4xbf16>, vector<4x32xbf16>, vector<8x32xf32> -> vector<8x32xf32>
    %133 = arith.addf %108, %132 : vector<8x32xf32>
    %134 = vector.extract_strided_slice %7 {offsets = [0, 20], sizes = [8, 4], strides = [1, 1]} : vector<8x96xf32> to vector<8x4xf32>
    %135 = arith.truncf %134 : vector<8x4xf32> to vector<8x4xbf16>
    %136 = vector.extract_strided_slice %7 {offsets = [0, 52], sizes = [8, 4], strides = [1, 1]} : vector<8x96xf32> to vector<8x4xf32>
    %137 = arith.truncf %136 : vector<8x4xf32> to vector<8x4xbf16>
    %138 = vector.extract_strided_slice %7 {offsets = [0, 84], sizes = [8, 4], strides = [1, 1]} : vector<8x96xf32> to vector<8x4xf32>
    %139 = arith.truncf %138 : vector<8x4xf32> to vector<8x4xbf16>
    %cst_43 = arith.constant dense<0.000000e+00> : vector<8x8xf32>
    %140 = tpu.matmul %135, %137, %cst_43 {dimension_numbers = #tpu.dot_dimension_numbers<[1], [1], [0], [0], [0, 0, 1, 0], [], []>} : vector<8x4xbf16>, vector<8x4xbf16>, vector<8x8xf32> -> vector<8x8xf32>
    %cst_44 = arith.constant 5.000000e-01 : f32
    %141 = vector.broadcast %cst_44 : f32 to vector<8x8xf32>
    %142 = arith.mulf %140, %141 : vector<8x8xf32>
    %cst_45 = arith.constant dense<0xFF800000> : vector<8xf32>
    %143 = vector.multi_reduction <maximumf>, %142, %cst_45 [1] : vector<8x8xf32> to vector<8xf32>
    %144 = vector.shape_cast %143 : vector<8xf32> to vector<8x1xf32>
    %145 = vector.broadcast %144 : vector<8x1xf32> to vector<8x8xf32>
    %146 = arith.subf %142, %145 : vector<8x8xf32>
    %147 = math.exp %146 : vector<8x8xf32>
    %cst_46 = arith.constant dense<0.000000e+00> : vector<8xf32>
    %148 = vector.multi_reduction <add>, %147, %cst_46 [1] : vector<8x8xf32> to vector<8xf32>
    %149 = vector.shape_cast %148 : vector<8xf32> to vector<8x1xf32>
    %150 = tpu.reciprocal %149 {approx = true} : vector<8x1xf32> -> vector<8x1xf32>
    %151 = vector.broadcast %150 : vector<8x1xf32> to vector<8x8xf32>
    %152 = arith.mulf %147, %151 : vector<8x8xf32>
    %153 = arith.truncf %152 : vector<8x8xf32> to vector<8x8xbf16>
    %cst_47 = arith.constant dense<0.000000e+00> : vector<8x4xf32>
    %154 = tpu.matmul %153, %139, %cst_47 {dimension_numbers = #tpu.dot_dimension_numbers<[1], [0], [0], [1], [0, 0, 1, 1], [], []>} : vector<8x8xbf16>, vector<8x4xbf16>, vector<8x4xf32> -> vector<8x4xf32>
    %155 = arith.truncf %154 : vector<8x4xf32> to vector<8x4xbf16>
    %c20 = arith.constant 20 : index
    %c0_48 = arith.constant 0 : index
    %156 = vector.load %arg4[%c20, %c0_48] : memref<32x32xbf16, #tpu.memory_space<vmem>>, vector<4x32xbf16>
    %cst_49 = arith.constant dense<0.000000e+00> : vector<8x32xf32>
    %157 = tpu.matmul %155, %156, %cst_49 {dimension_numbers = #tpu.dot_dimension_numbers<[1], [0], [0], [1], [0, 0, 1, 1], [], []>} : vector<8x4xbf16>, vector<4x32xbf16>, vector<8x32xf32> -> vector<8x32xf32>
    %158 = arith.addf %133, %157 : vector<8x32xf32>
    %159 = vector.extract_strided_slice %7 {offsets = [0, 24], sizes = [8, 4], strides = [1, 1]} : vector<8x96xf32> to vector<8x4xf32>
    %160 = arith.truncf %159 : vector<8x4xf32> to vector<8x4xbf16>
    %161 = vector.extract_strided_slice %7 {offsets = [0, 56], sizes = [8, 4], strides = [1, 1]} : vector<8x96xf32> to vector<8x4xf32>
    %162 = arith.truncf %161 : vector<8x4xf32> to vector<8x4xbf16>
    %163 = vector.extract_strided_slice %7 {offsets = [0, 88], sizes = [8, 4], strides = [1, 1]} : vector<8x96xf32> to vector<8x4xf32>
    %164 = arith.truncf %163 : vector<8x4xf32> to vector<8x4xbf16>
    %cst_50 = arith.constant dense<0.000000e+00> : vector<8x8xf32>
    %165 = tpu.matmul %160, %162, %cst_50 {dimension_numbers = #tpu.dot_dimension_numbers<[1], [1], [0], [0], [0, 0, 1, 0], [], []>} : vector<8x4xbf16>, vector<8x4xbf16>, vector<8x8xf32> -> vector<8x8xf32>
    %cst_51 = arith.constant 5.000000e-01 : f32
    %166 = vector.broadcast %cst_51 : f32 to vector<8x8xf32>
    %167 = arith.mulf %165, %166 : vector<8x8xf32>
    %cst_52 = arith.constant dense<0xFF800000> : vector<8xf32>
    %168 = vector.multi_reduction <maximumf>, %167, %cst_52 [1] : vector<8x8xf32> to vector<8xf32>
    %169 = vector.shape_cast %168 : vector<8xf32> to vector<8x1xf32>
    %170 = vector.broadcast %169 : vector<8x1xf32> to vector<8x8xf32>
    %171 = arith.subf %167, %170 : vector<8x8xf32>
    %172 = math.exp %171 : vector<8x8xf32>
    %cst_53 = arith.constant dense<0.000000e+00> : vector<8xf32>
    %173 = vector.multi_reduction <add>, %172, %cst_53 [1] : vector<8x8xf32> to vector<8xf32>
    %174 = vector.shape_cast %173 : vector<8xf32> to vector<8x1xf32>
    %175 = tpu.reciprocal %174 {approx = true} : vector<8x1xf32> -> vector<8x1xf32>
    %176 = vector.broadcast %175 : vector<8x1xf32> to vector<8x8xf32>
    %177 = arith.mulf %172, %176 : vector<8x8xf32>
    %178 = arith.truncf %177 : vector<8x8xf32> to vector<8x8xbf16>
    %cst_54 = arith.constant dense<0.000000e+00> : vector<8x4xf32>
    %179 = tpu.matmul %178, %164, %cst_54 {dimension_numbers = #tpu.dot_dimension_numbers<[1], [0], [0], [1], [0, 0, 1, 1], [], []>} : vector<8x8xbf16>, vector<8x4xbf16>, vector<8x4xf32> -> vector<8x4xf32>
    %180 = arith.truncf %179 : vector<8x4xf32> to vector<8x4xbf16>
    %c24 = arith.constant 24 : index
    %c0_55 = arith.constant 0 : index
    %181 = vector.load %arg4[%c24, %c0_55] : memref<32x32xbf16, #tpu.memory_space<vmem>>, vector<4x32xbf16>
    %cst_56 = arith.constant dense<0.000000e+00> : vector<8x32xf32>
    %182 = tpu.matmul %180, %181, %cst_56 {dimension_numbers = #tpu.dot_dimension_numbers<[1], [0], [0], [1], [0, 0, 1, 1], [], []>} : vector<8x4xbf16>, vector<4x32xbf16>, vector<8x32xf32> -> vector<8x32xf32>
    %183 = arith.addf %158, %182 : vector<8x32xf32>
    %184 = vector.extract_strided_slice %7 {offsets = [0, 28], sizes = [8, 4], strides = [1, 1]} : vector<8x96xf32> to vector<8x4xf32>
    %185 = arith.truncf %184 : vector<8x4xf32> to vector<8x4xbf16>
    %186 = vector.extract_strided_slice %7 {offsets = [0, 60], sizes = [8, 4], strides = [1, 1]} : vector<8x96xf32> to vector<8x4xf32>
    %187 = arith.truncf %186 : vector<8x4xf32> to vector<8x4xbf16>
    %188 = vector.extract_strided_slice %7 {offsets = [0, 92], sizes = [8, 4], strides = [1, 1]} : vector<8x96xf32> to vector<8x4xf32>
    %189 = arith.truncf %188 : vector<8x4xf32> to vector<8x4xbf16>
    %cst_57 = arith.constant dense<0.000000e+00> : vector<8x8xf32>
    %190 = tpu.matmul %185, %187, %cst_57 {dimension_numbers = #tpu.dot_dimension_numbers<[1], [1], [0], [0], [0, 0, 1, 0], [], []>} : vector<8x4xbf16>, vector<8x4xbf16>, vector<8x8xf32> -> vector<8x8xf32>
    %cst_58 = arith.constant 5.000000e-01 : f32
    %191 = vector.broadcast %cst_58 : f32 to vector<8x8xf32>
    %192 = arith.mulf %190, %191 : vector<8x8xf32>
    %cst_59 = arith.constant dense<0xFF800000> : vector<8xf32>
    %193 = vector.multi_reduction <maximumf>, %192, %cst_59 [1] : vector<8x8xf32> to vector<8xf32>
    %194 = vector.shape_cast %193 : vector<8xf32> to vector<8x1xf32>
    %195 = vector.broadcast %194 : vector<8x1xf32> to vector<8x8xf32>
    %196 = arith.subf %192, %195 : vector<8x8xf32>
    %197 = math.exp %196 : vector<8x8xf32>
    %cst_60 = arith.constant dense<0.000000e+00> : vector<8xf32>
    %198 = vector.multi_reduction <add>, %197, %cst_60 [1] : vector<8x8xf32> to vector<8xf32>
    %199 = vector.shape_cast %198 : vector<8xf32> to vector<8x1xf32>
    %200 = tpu.reciprocal %199 {approx = true} : vector<8x1xf32> -> vector<8x1xf32>
    %201 = vector.broadcast %200 : vector<8x1xf32> to vector<8x8xf32>
    %202 = arith.mulf %197, %201 : vector<8x8xf32>
    %203 = arith.truncf %202 : vector<8x8xf32> to vector<8x8xbf16>
    %cst_61 = arith.constant dense<0.000000e+00> : vector<8x4xf32>
    %204 = tpu.matmul %203, %189, %cst_61 {dimension_numbers = #tpu.dot_dimension_numbers<[1], [0], [0], [1], [0, 0, 1, 1], [], []>} : vector<8x8xbf16>, vector<8x4xbf16>, vector<8x4xf32> -> vector<8x4xf32>
    %205 = arith.truncf %204 : vector<8x4xf32> to vector<8x4xbf16>
    %c28 = arith.constant 28 : index
    %c0_62 = arith.constant 0 : index
    %206 = vector.load %arg4[%c28, %c0_62] : memref<32x32xbf16, #tpu.memory_space<vmem>>, vector<4x32xbf16>
    %cst_63 = arith.constant dense<0.000000e+00> : vector<8x32xf32>
    %207 = tpu.matmul %205, %206, %cst_63 {dimension_numbers = #tpu.dot_dimension_numbers<[1], [0], [0], [1], [0, 0, 1, 1], [], []>} : vector<8x4xbf16>, vector<4x32xbf16>, vector<8x32xf32> -> vector<8x32xf32>
    %208 = arith.addf %183, %207 : vector<8x32xf32>
    %c0_64 = arith.constant 0 : index
    %c0_65 = arith.constant 0 : index
    %209 = vector.load %arg5[%c0_64, %c0_65] : memref<1x32xf32, #tpu.memory_space<vmem>>, vector<1x32xf32>
    %210 = vector.broadcast %209 : vector<1x32xf32> to vector<8x32xf32>
    %211 = arith.addf %208, %210 : vector<8x32xf32>
    %212 = arith.addf %1, %211 : vector<8x32xf32>
    %c0_66 = arith.constant 0 : index
    %c0_67 = arith.constant 0 : index
    %213 = vector.load %arg6[%c0_66, %c0_67] : memref<1x32xf32, #tpu.memory_space<vmem>>, vector<1x32xf32>
    %c0_68 = arith.constant 0 : index
    %c0_69 = arith.constant 0 : index
    %214 = vector.load %arg7[%c0_68, %c0_69] : memref<1x32xf32, #tpu.memory_space<vmem>>, vector<1x32xf32>
    %cst_70 = arith.constant dense<0.000000e+00> : vector<8xf32>
    %215 = vector.multi_reduction <add>, %212, %cst_70 [1] : vector<8x32xf32> to vector<8xf32>
    %216 = vector.shape_cast %215 : vector<8xf32> to vector<8x1xf32>
    %cst_71 = arith.constant 3.200000e+01 : f32
    %217 = vector.broadcast %cst_71 : f32 to vector<8x1xf32>
    %218 = arith.divf %216, %217 : vector<8x1xf32>
    %219 = vector.broadcast %218 : vector<8x1xf32> to vector<8x32xf32>
    %220 = arith.subf %212, %219 : vector<8x32xf32>
    %221 = arith.mulf %220, %220 : vector<8x32xf32>
    %cst_72 = arith.constant dense<0.000000e+00> : vector<8xf32>
    %222 = vector.multi_reduction <add>, %221, %cst_72 [1] : vector<8x32xf32> to vector<8xf32>
    %223 = vector.shape_cast %222 : vector<8xf32> to vector<8x1xf32>
    %cst_73 = arith.constant 3.200000e+01 : f32
    %224 = vector.broadcast %cst_73 : f32 to vector<8x1xf32>
    %225 = arith.divf %223, %224 : vector<8x1xf32>
    %226 = vector.broadcast %218 : vector<8x1xf32> to vector<8x32xf32>
    %227 = arith.subf %212, %226 : vector<8x32xf32>
    %cst_74 = arith.constant 9.99999974E-6 : f32
    %228 = vector.broadcast %cst_74 : f32 to vector<8x1xf32>
    %229 = arith.addf %225, %228 : vector<8x1xf32>
    %230 = math.rsqrt %229 : vector<8x1xf32>
    %231 = vector.broadcast %230 : vector<8x1xf32> to vector<8x32xf32>
    %232 = arith.mulf %227, %231 : vector<8x32xf32>
    %233 = vector.broadcast %213 : vector<1x32xf32> to vector<8x32xf32>
    %234 = arith.mulf %232, %233 : vector<8x32xf32>
    %235 = vector.broadcast %214 : vector<1x32xf32> to vector<8x32xf32>
    %236 = arith.addf %234, %235 : vector<8x32xf32>
    %c0_75 = arith.constant 0 : index
    %c0_76 = arith.constant 0 : index
    %237 = vector.load %arg8[%c0_75, %c0_76] : memref<1x32xf32, #tpu.memory_space<vmem>>, vector<1x32xf32>
    %238 = vector.broadcast %237 : vector<1x32xf32> to vector<8x32xf32>
    %239 = arith.addf %236, %238 : vector<8x32xf32>
    %240 = arith.truncf %239 : vector<8x32xf32> to vector<8x32xbf16>
    %c0_77 = arith.constant 0 : index
    %c0_78 = arith.constant 0 : index
    %241 = vector.load %arg9[%c0_77, %c0_78] : memref<32x64xbf16, #tpu.memory_space<vmem>>, vector<32x64xbf16>
    %cst_79 = arith.constant dense<0.000000e+00> : vector<8x64xf32>
    %242 = tpu.matmul %240, %241, %cst_79 {dimension_numbers = #tpu.dot_dimension_numbers<[1], [0], [0], [1], [0, 0, 1, 1], [], []>} : vector<8x32xbf16>, vector<32x64xbf16>, vector<8x64xf32> -> vector<8x64xf32>
    %c0_80 = arith.constant 0 : index
    %c0_81 = arith.constant 0 : index
    %243 = vector.load %arg10[%c0_80, %c0_81] : memref<1x64xf32, #tpu.memory_space<vmem>>, vector<1x64xf32>
    %244 = vector.broadcast %243 : vector<1x64xf32> to vector<8x64xf32>
    %245 = arith.addf %242, %244 : vector<8x64xf32>
    %cst_82 = arith.constant 0.000000e+00 : f32
    %246 = vector.broadcast %cst_82 : f32 to vector<8x64xf32>
    %247 = arith.maximumf %245, %246 : vector<8x64xf32>
    %248 = arith.truncf %247 : vector<8x64xf32> to vector<8x64xbf16>
    %c0_83 = arith.constant 0 : index
    %c0_84 = arith.constant 0 : index
    %249 = vector.load %arg11[%c0_83, %c0_84] : memref<64x32xbf16, #tpu.memory_space<vmem>>, vector<64x32xbf16>
    %cst_85 = arith.constant dense<0.000000e+00> : vector<8x32xf32>
    %250 = tpu.matmul %248, %249, %cst_85 {dimension_numbers = #tpu.dot_dimension_numbers<[1], [0], [0], [1], [0, 0, 1, 1], [], []>} : vector<8x64xbf16>, vector<64x32xbf16>, vector<8x32xf32> -> vector<8x32xf32>
    %c0_86 = arith.constant 0 : index
    %c0_87 = arith.constant 0 : index
    %251 = vector.load %arg12[%c0_86, %c0_87] : memref<1x32xf32, #tpu.memory_space<vmem>>, vector<1x32xf32>
    %252 = vector.broadcast %251 : vector<1x32xf32> to vector<8x32xf32>
    %253 = arith.addf %250, %252 : vector<8x32xf32>
    %254 = arith.mulf %253, %253 : vector<8x32xf32>
    %cst_88 = arith.constant dense<0.000000e+00> : vector<8xf32>
    %255 = vector.multi_reduction <add>, %254, %cst_88 [1] : vector<8x32xf32> to vector<8xf32>
    %256 = vector.shape_cast %255 : vector<8xf32> to vector<8x1xf32>
    %cst_89 = arith.constant 9.99999996E-13 : f32
    %257 = vector.broadcast %cst_89 : f32 to vector<8x1xf32>
    %258 = arith.addf %256, %257 : vector<8x1xf32>
    %259 = math.rsqrt %258 : vector<8x1xf32>
    %cst_90 = arith.constant 1.000000e+00 : f32
    %260 = vector.broadcast %cst_90 : f32 to vector<8x1xf32>
    %261 = arith.mulf %260, %259 : vector<8x1xf32>
    %262 = vector.broadcast %261 : vector<8x1xf32> to vector<8x32xf32>
    %263 = arith.mulf %253, %262 : vector<8x32xf32>
    %264 = arith.addf %236, %263 : vector<8x32xf32>
    %c0_91 = arith.constant 0 : index
    %c0_92 = arith.constant 0 : index
    %265 = vector.load %arg13[%c0_91, %c0_92] : memref<1x32xf32, #tpu.memory_space<vmem>>, vector<1x32xf32>
    %c0_93 = arith.constant 0 : index
    %c0_94 = arith.constant 0 : index
    %266 = vector.load %arg14[%c0_93, %c0_94] : memref<1x32xf32, #tpu.memory_space<vmem>>, vector<1x32xf32>
    %cst_95 = arith.constant dense<0.000000e+00> : vector<8xf32>
    %267 = vector.multi_reduction <add>, %264, %cst_95 [1] : vector<8x32xf32> to vector<8xf32>
    %268 = vector.shape_cast %267 : vector<8xf32> to vector<8x1xf32>
    %cst_96 = arith.constant 3.200000e+01 : f32
    %269 = vector.broadcast %cst_96 : f32 to vector<8x1xf32>
    %270 = arith.divf %268, %269 : vector<8x1xf32>
    %271 = vector.broadcast %270 : vector<8x1xf32> to vector<8x32xf32>
    %272 = arith.subf %264, %271 : vector<8x32xf32>
    %273 = arith.mulf %272, %272 : vector<8x32xf32>
    %cst_97 = arith.constant dense<0.000000e+00> : vector<8xf32>
    %274 = vector.multi_reduction <add>, %273, %cst_97 [1] : vector<8x32xf32> to vector<8xf32>
    %275 = vector.shape_cast %274 : vector<8xf32> to vector<8x1xf32>
    %cst_98 = arith.constant 3.200000e+01 : f32
    %276 = vector.broadcast %cst_98 : f32 to vector<8x1xf32>
    %277 = arith.divf %275, %276 : vector<8x1xf32>
    %278 = vector.broadcast %270 : vector<8x1xf32> to vector<8x32xf32>
    %279 = arith.subf %264, %278 : vector<8x32xf32>
    %cst_99 = arith.constant 9.99999974E-6 : f32
    %280 = vector.broadcast %cst_99 : f32 to vector<8x1xf32>
    %281 = arith.addf %277, %280 : vector<8x1xf32>
    %282 = math.rsqrt %281 : vector<8x1xf32>
    %283 = vector.broadcast %282 : vector<8x1xf32> to vector<8x32xf32>
    %284 = arith.mulf %279, %283 : vector<8x32xf32>
    %285 = vector.broadcast %265 : vector<1x32xf32> to vector<8x32xf32>
    %286 = arith.mulf %284, %285 : vector<8x32xf32>
    %287 = vector.broadcast %266 : vector<1x32xf32> to vector<8x32xf32>
    %288 = arith.addf %286, %287 : vector<8x32xf32>
    %c0_100 = arith.constant 0 : index
    %c0_101 = arith.constant 0 : index
    %c0_102 = arith.constant 0 : index
    %289 = vector.load %arg19[%c0_100, %c0_101, %c0_102] : memref<1x8x32xf32, #tpu.memory_space<vmem>>, vector<1x8x32xf32>
    %290 = vector.shape_cast %289 : vector<1x8x32xf32> to vector<8x32xf32>
    %291 = vector.shape_cast %288 : vector<8x32xf32> to vector<1x8x32xf32>
    tpu.vector_store %arg19[%c0_100, %c0_101, %c0_102], %291 {strides = array<i32>} : memref<1x8x32xf32, #tpu.memory_space<vmem>>, vector<1x8x32xf32>,
    %292 = arith.truncf %288 : vector<8x32xf32> to vector<8x32xbf16>
    %c0_103 = arith.constant 0 : index
    %c0_104 = arith.constant 0 : index
    %293 = vector.load %arg15[%c0_103, %c0_104] : memref<32x64xbf16, #tpu.memory_space<vmem>>, vector<32x64xbf16>
    %cst_105 = arith.constant dense<0.000000e+00> : vector<8x64xf32>
    %294 = tpu.matmul %292, %293, %cst_105 {dimension_numbers = #tpu.dot_dimension_numbers<[1], [0], [0], [1], [0, 0, 1, 1], [], []>} : vector<8x32xbf16>, vector<32x64xbf16>, vector<8x64xf32> -> vector<8x64xf32>
    %c0_106 = arith.constant 0 : index
    %c0_107 = arith.constant 0 : index
    %295 = vector.load %arg16[%c0_106, %c0_107] : memref<1x64xf32, #tpu.memory_space<vmem>>, vector<1x64xf32>
    %296 = vector.broadcast %295 : vector<1x64xf32> to vector<8x64xf32>
    %297 = arith.addf %294, %296 : vector<8x64xf32>
    %cst_108 = arith.constant 0.000000e+00 : f32
    %298 = vector.broadcast %cst_108 : f32 to vector<8x64xf32>
    %299 = arith.maximumf %297, %298 : vector<8x64xf32>
    %300 = arith.truncf %299 : vector<8x64xf32> to vector<8x64xbf16>
    %c0_109 = arith.constant 0 : index
    %c0_110 = arith.constant 0 : index
    %301 = vector.load %arg17[%c0_109, %c0_110] : memref<64x128xbf16, #tpu.memory_space<vmem>>, vector<64x128xbf16>
    %cst_111 = arith.constant dense<0.000000e+00> : vector<8x128xf32>
    %302 = tpu.matmul %300, %301, %cst_111 {dimension_numbers = #tpu.dot_dimension_numbers<[1], [0], [0], [1], [0, 0, 1, 1], [], []>} : vector<8x64xbf16>, vector<64x128xbf16>, vector<8x128xf32> -> vector<8x128xf32>
    %c0_112 = arith.constant 0 : index
    %c0_113 = arith.constant 0 : index
    %303 = vector.load %arg18[%c0_112, %c0_113] : memref<1x128xf32, #tpu.memory_space<vmem>>, vector<1x128xf32>
    %304 = vector.broadcast %303 : vector<1x128xf32> to vector<8x128xf32>
    %305 = arith.addf %302, %304 : vector<8x128xf32>
    %306 = vector.extract_strided_slice %305 {offsets = [0, 0], sizes = [8, 3], strides = [1, 1]} : vector<8x128xf32> to vector<8x3xf32>
    %307 = arith.mulf %306, %306 : vector<8x3xf32>
    %cst_114 = arith.constant dense<0.000000e+00> : vector<8xf32>
    %308 = vector.multi_reduction <add>, %307, %cst_114 [1] : vector<8x3xf32> to vector<8xf32>
    %309 = vector.shape_cast %308 : vector<8xf32> to vector<8x1xf32>
    %310 = math.sqrt %309 : vector<8x1xf32>
    %311 = vector.extract_strided_slice %305 {offsets = [0, 3], sizes = [8, 1], strides = [1, 1]} : vector<8x128xf32> to vector<8x1xf32>
    %312 = math.absf %311 : vector<8x1xf32>
    %313 = arith.addf %310, %312 : vector<8x1xf32>
    %cst_115 = arith.constant dense<0.000000e+00> : vector<1xf32>
    %314 = vector.multi_reduction <add>, %313, %cst_115 [0] : vector<8x1xf32> to vector<1xf32>
    %315 = vector.shape_cast %314 : vector<1xf32> to vector<1x1xf32>
    %c0_116 = arith.constant 0 : index
    %c0_117 = arith.constant 0 : index
    %c0_118 = arith.constant 0 : index
    %316 = vector.load %arg20[%c0_116, %c0_117, %c0_118] : memref<1x1x1xf32, #tpu.memory_space<vmem>>, vector<1x1x1xf32>
    %317 = vector.shape_cast %316 : vector<1x1x1xf32> to vector<1x1xf32>
    %318 = vector.shape_cast %315 : vector<1x1xf32> to vector<1x1x1xf32>
    tpu.vector_store %arg20[%c0_116, %c0_117, %c0_118], %318 {strides = array<i32>} : memref<1x1x1xf32, #tpu.memory_space<vmem>>, vector<1x1x1xf32>,
    return
  }
  func.func @transform_0(%arg0: i32) -> (i32, i32, i32) {
    %c0_i32 = arith.constant 0 : i32
    %c0_i32_0 = arith.constant 0 : i32
    %c0_i32_1 = arith.constant 0 : i32
    return %arg0, %c0_i32, %c0_i32_0 : i32, i32, i32
  }
  func.func @transform_1(%arg0: i32) -> (i32, i32) {
    %c0_i32 = arith.constant 0 : i32
    %c0_i32_0 = arith.constant 0 : i32
    %c0_i32_1 = arith.constant 0 : i32
    return %c0_i32, %c0_i32_0 : i32, i32
  }
  func.func @transform_2(%arg0: i32) -> (i32, i32) {
    %c0_i32 = arith.constant 0 : i32
    %c0_i32_0 = arith.constant 0 : i32
    %c0_i32_1 = arith.constant 0 : i32
    return %c0_i32, %c0_i32_0 : i32, i32
  }
  func.func @transform_3(%arg0: i32) -> (i32, i32) {
    %c0_i32 = arith.constant 0 : i32
    %c0_i32_0 = arith.constant 0 : i32
    %c0_i32_1 = arith.constant 0 : i32
    return %c0_i32, %c0_i32_0 : i32, i32
  }
  func.func @transform_4(%arg0: i32) -> (i32, i32) {
    %c0_i32 = arith.constant 0 : i32
    %c0_i32_0 = arith.constant 0 : i32
    %c0_i32_1 = arith.constant 0 : i32
    return %c0_i32, %c0_i32_0 : i32, i32
  }
  func.func @transform_5(%arg0: i32) -> (i32, i32) {
    %c0_i32 = arith.constant 0 : i32
    %c0_i32_0 = arith.constant 0 : i32
    %c0_i32_1 = arith.constant 0 : i32
    return %c0_i32, %c0_i32_0 : i32, i32
  }
  func.func @transform_6(%arg0: i32) -> (i32, i32) {
    %c0_i32 = arith.constant 0 : i32
    %c0_i32_0 = arith.constant 0 : i32
    %c0_i32_1 = arith.constant 0 : i32
    return %c0_i32, %c0_i32_0 : i32, i32
  }
  func.func @transform_7(%arg0: i32) -> (i32, i32) {
    %c0_i32 = arith.constant 0 : i32
    %c0_i32_0 = arith.constant 0 : i32
    %c0_i32_1 = arith.constant 0 : i32
    return %c0_i32, %c0_i32_0 : i32, i32
  }
  func.func @transform_8(%arg0: i32) -> (i32, i32) {
    %c0_i32 = arith.constant 0 : i32
    %c0_i32_0 = arith.constant 0 : i32
    %c0_i32_1 = arith.constant 0 : i32
    return %c0_i32, %c0_i32_0 : i32, i32
  }
  func.func @transform_9(%arg0: i32) -> (i32, i32) {
    %c0_i32 = arith.constant 0 : i32
    %c0_i32_0 = arith.constant 0 : i32
    %c0_i32_1 = arith.constant 0 : i32
    return %c0_i32, %c0_i32_0 : i32, i32
  }
  func.func @transform_10(%arg0: i32) -> (i32, i32) {
    %c0_i32 = arith.constant 0 : i32
    %c0_i32_0 = arith.constant 0 : i32
    %c0_i32_1 = arith.constant 0 : i32
    return %c0_i32, %c0_i32_0 : i32, i32
  }
  func.func @transform_11(%arg0: i32) -> (i32, i32) {
    %c0_i32 = arith.constant 0 : i32
    %c0_i32_0 = arith.constant 0 : i32
    %c0_i32_1 = arith.constant 0 : i32
    return %c0_i32, %c0_i32_0 : i32, i32
  }
  func.func @transform_12(%arg0: i32) -> (i32, i32) {
    %c0_i32 = arith.constant 0 : i32
    %c0_i32_0 = arith.constant 0 : i32
    %c0_i32_1 = arith.constant 0 : i32
    return %c0_i32, %c0_i32_0 : i32, i32
  }
  func.func @transform_13(%arg0: i32) -> (i32, i32) {
    %c0_i32 = arith.constant 0 : i32
    %c0_i32_0 = arith.constant 0 : i32
    %c0_i32_1 = arith.constant 0 : i32
    return %c0_i32, %c0_i32_0 : i32, i32
  }
  func.func @transform_14(%arg0: i32) -> (i32, i32) {
    %c0_i32 = arith.constant 0 : i32
    %c0_i32_0 = arith.constant 0 : i32
    %c0_i32_1 = arith.constant 0 : i32
    return %c0_i32, %c0_i32_0 : i32, i32
  }
  func.func @transform_15(%arg0: i32) -> (i32, i32) {
    %c0_i32 = arith.constant 0 : i32
    %c0_i32_0 = arith.constant 0 : i32
    %c0_i32_1 = arith.constant 0 : i32
    return %c0_i32, %c0_i32_0 : i32, i32
  }
  func.func @transform_16(%arg0: i32) -> (i32, i32) {
    %c0_i32 = arith.constant 0 : i32
    %c0_i32_0 = arith.constant 0 : i32
    %c0_i32_1 = arith.constant 0 : i32
    return %c0_i32, %c0_i32_0 : i32, i32
  }
  func.func @transform_17(%arg0: i32) -> (i32, i32) {
    %c0_i32 = arith.constant 0 : i32
    %c0_i32_0 = arith.constant 0 : i32
    %c0_i32_1 = arith.constant 0 : i32
    return %c0_i32, %c0_i32_0 : i32, i32
  }
  func.func @transform_18(%arg0: i32) -> (i32, i32, i32) {
    %c0_i32 = arith.constant 0 : i32
    %c0_i32_0 = arith.constant 0 : i32
    %c0_i32_1 = arith.constant 0 : i32
    return %arg0, %c0_i32, %c0_i32_0 : i32, i32, i32
  }
  func.func @transform_19(%arg0: i32) -> (i32, i32, i32) {
    %c0_i32 = arith.constant 0 : i32
    %c0_i32_0 = arith.constant 0 : i32
    %c0_i32_1 = arith.constant 0 : i32
    return %arg0, %c0_i32, %c0_i32_0 : i32, i32, i32
  }
}

</mosaic_0001>

<bundles_post_ra>
// kernel: tpu_custom_call.1
= control target key start
LH: loop header
LB: loop body
LE: loop exit
PB: predicated region body
PF: predicated region fallthrough
CT: control target
= control target key end

     0   :  { %s4159_s0 = inlined_call_operand.vmem [shape: f32[2,8,32], index: 0, kind: input, shape index: {}]   ;;  %s4160_s1 = inlined_call_operand.hbm [shape: bf16[32,96], index: 1, kind: input, shape index: {}]   ;;  %s4161_s2 = inlined_call_operand.vmem [shape: f32[1,96], index: 2, kind: input, shape index: {}]   ;;  %s4162_s3 = inlined_call_operand.hbm [shape: bf16[32,32], index: 3, kind: input, shape index: {}]   ;;  %s4163_s4 = inlined_call_operand.vmem [shape: f32[1,32], index: 4, kind: input, shape index: {}]   ;;  %s4164_s5 = inlined_call_operand.hbm [shape: f32[1,32], index: 5, kind: input, shape index: {}]   ;;  %s4165_s6 = inlined_call_operand.hbm [shape: f32[1,32], index: 6, kind: input, shape index: {}]   ;;  %s4166_s7 = inlined_call_operand.hbm [shape: f32[1,32], index: 7, kind: input, shape index: {}]   ;;  %s4167_s8 = inlined_call_operand.hbm [shape: bf16[32,64], index: 8, kind: input, shape index: {}]   ;;  %s4168_s9 = inlined_call_operand.hbm [shape: f32[1,64], index: 9, kind: input, shape index: {}]   ;;  %s4169_s10 = inlined_call_operand.vmem [shape: bf16[64,32], index: 10, kind: input, shape index: {}]   ;;  %s4170_s11 = inlined_call_operand.vmem [shape: f32[1,32], index: 11, kind: input, shape index: {}]   ;;  %s4171_s12 = inlined_call_operand.vmem [shape: f32[1,32], index: 12, kind: input, shape index: {}]   ;;  %s4172_s13 = inlined_call_operand.vmem [shape: f32[1,32], index: 13, kind: input, shape index: {}]   ;;  %s4173_s14 = inlined_call_operand.vmem [shape: bf16[32,64], index: 14, kind: input, shape index: {}]   ;;  %s4174_s15 = inlined_call_operand.vmem [shape: f32[1,64], index: 15, kind: input, shape index: {}]   ;;  %s4175_s16 = inlined_call_operand.vmem [shape: bf16[64,128], index: 16, kind: input, shape index: {}]   ;;  %s4176_s17 = inlined_call_operand.vmem [shape: f32[1,128], index: 17, kind: input, shape index: {}]   ;;  %s4177_s18 = inlined_call_operand.hbm [shape: f32[2,8,32], index: 18, kind: output, shape index: {0}]   ;;  %s4178_s19 = inlined_call_operand.vmem [shape: f32[2,1,1], index: 19, kind: output, shape index: {1}]  }
   0x1   :  { %4195 = sst [smem:[#allocation27_spill]] %s4159_s0 }
   0x2   :  { %4196 = sst [smem:[#allocation28_spill]] %s4160_s1 }
   0x3   :  { %4197 = sst [smem:[#allocation29_spill]] %s4161_s2 }
   0x4   :  { %4198 = sst [smem:[#allocation30_spill]] %s4162_s3 }
   0x5   :  { %4199 = sst [smem:[#allocation31_spill]] %s4165_s6 }
   0x6   :  { %4200 = sst [smem:[#allocation32_spill]] %s4174_s15 }
   0x7   :  { %4201 = sst [smem:[#allocation33_spill]] %s4175_s16 }
   0x8   :  { %4202 = sst [smem:[#allocation34_spill]] %s4176_s17 }
   0x9   :  { %4203 = sst [smem:[#allocation35_spill]] %s4177_s18 }
   0xa   :  { %4204 = sst [smem:[#allocation36_spill]] %s4178_s19 }
   0xb   :  { %25 = vsyncpa [#allocation3], 0 }
   0xc   :  { %26 = vsyncpa [#allocation6], 0 }
   0xd   :  { %27 = vsyncpa [#allocation9], 0 }
   0xe   :  { %28 = vsyncpa [#allocation12], 0 }
   0xf   :  { %29 = vsyncpa [#allocation4], 0 }
  0x10   :  { %31 = vsyncpa [#allocation4 + $0x1], 0  ;;  %s3601_s0 = smov 0   ;;  %s3603_s30 = smov 0  }
  0x11   :  { %s3605_s20 = smov 0   ;;  %s3607_s21 = smov 0  }
  0x12 LB: > { %4205 = sst [smem:[#allocation20_spill]] %s3451_s0  ;;  %s3622_s1 = sadd.s32 4294967295, %s3463_s21   ;;  %s3463_s21 = sphi %s3607_s21, %s4244_s21   ;;  %s3459_s20 = sphi %s3605_s20, %s4246_s20   ;;  %s3455_s30 = sphi %s3603_s30, %s4248_s30   ;;  %s3451_s0 = sphi %s3601_s0, %s4247_s0  }
  0x13   : > { %4206 = sst [smem:[#allocation21_spill]] %s3459_s20  ;;  %s2652_s22 = sadd.s32 4294967294, %s3463_s21  }
  0x14   : > { %4207 = sst [smem:[#allocation22_spill]] %s3463_s21  ;;  %s3626_s2 = sadd.s32 1, %s3463_s21  }
  0x15   : > { %4208 = sst [smem:[#allocation23_spill]] %s3626_s2  ;;  %s427_s23 = sadd.s32 1, %s3459_s20 }
  0x16   : > { %s424_s24 = ssub.s32 %s3463_s21, %s3626_s2  ;;  %p437_p0 = scmp.ne.s32.totalorder %s3459_s20, %s3455_s30 }
  0x17   : > { %p425_p1 = scmp.eq.s32.totalorder %s424_s24, 0  ;;  %p438_p2 = scmp.eq.s32.totalorder %s3622_s1, 1 }
  0x18   : > { %p443_p3 = scmp.ne.s32.totalorder %s3455_s30, %s3451_s0  ;;  %p444_p4 = scmp.eq.s32.totalorder %s2652_s22, 1 }
  0x19   : > { %s3637_s25 = scalar_select %p425_p1, %s3459_s20, %s427_s23  }
  0x1a   : > { %p3639_p5 = por %p438_p2, %p437_p0  ;;  %p3643_p6 = por %p444_p4, %p443_p3 }
  0x1b   : > { %4209 = sst [smem:[#allocation24_spill]] %s3637_s25  ;;  %p2653_p7 = scmp.ge.s32.totalorder %s3463_s21, 1 }
  0x1c   : > { %s4210_s3 = scalar_select %p3639_p5, 1, 0 }
  0x1d   : > { %s4212_s26 = scalar_select %p3643_p6, 1, 0 }
  0x1e   : > { %4211 = sst [smem:[#allocation25_spill]] %s4210_s3  ;;  %p477_p8 = scmp.lt.s32.totalorder %s3463_s21, 3 }
  0x1f   : > { %4213 = sst [smem:[#allocation26_spill]] %s4212_s26  ;;  %p4190_p9 = scmp.eq.s32.totalorder %s3622_s1, 0 }
  0x20   : > { %p3650_p10 = pnand %p2653_p7, %p477_p8  ;;  %s3465_s28 = smov [#allocation5]  }
  0x21   : > { %s505_s29 = sshll.u32 %s3465_s28, 4  ;;  %s3466_s23 = smov [#allocation8]   ;;  %s3656_s29 = int_to_ptr.vmem [resolvable:$true] %s505_s29 }
  0x22   : > { %s4214_s27 = scalar_select %p3650_p10, 1, 0 }
  0x23   : > { %p3023_p11 = pneg %p3650_p10  ;;  %s533_s24 = sshll.u32 %s3466_s23, 4  ;;  %s3664_s24 = int_to_ptr.vmem [resolvable:$true] %s533_s24 }
  0x24   : > { %s3467_s25 = smov [#allocation11]   ;;  %s4216_s0 = sld [smem:[#allocation30_spill]] }
  0x25   : > { %p3660_p12 = pnand %p4190_p9, %p3023_p11  ;;  %s3666_s20 = sshll.u32 %s3467_s25, 4  ;;  %s555_s20 = int_to_ptr.vmem [resolvable:$true] %s3666_s20 }
  0x27   : > { %p3676_p0 = pneg %p3660_p12 }
  0x2a   : > { %s4217_s19 = smov %s4216_s0  ;;  %s3189_s21 = scalar_lea.hbm %s4216_s0, 256 }
  0x2b   : > { %p3190_p13 = scmp.ne.s32.totalorder %s4217_s19, %s3189_s21  ;;  %p3196_p3 = scmp.lt.u32.totalorder %s3189_s21, %s4217_s19 }
  0x2d   : > { %p3192_p1 = pnand %p3676_p0, %p3190_p13 }
  0x2f   : > { %p3193_p2 = pneg %p3192_p1 }
  0x31   : > { %p3198_p4 = pnand %p3196_p3, %p3193_p2 }
  0x33   : > { %3201 = shalt.err (!%p3198_p4)
}
  0x34   : > { %s3202_s18 = scalar_lea.vmem %s3656_s29, 256  ;;  %p3210_p9 = scmp.lt.s32.totalorder %s3656_s29, %s3656_s29 }
  0x35   : > { %p3203_p7 = scmp.ne.s32.totalorder %s3656_s29, %s3202_s18  ;;  %p3211_p6 = scmp.lt.s32.totalorder %s3202_s18, %s3202_s18 }
  0x37   : > { %p3205_p8 = pnand %p3203_p7, %p3676_p0  ;;  %p3212_p13 = por %p3211_p6, %p3210_p9 }
  0x39   : > { %p3206_p11 = pneg %p3205_p8 }
  0x3b   : > { %p3213_p1 = pnand %p3212_p13, %p3206_p11 }
  0x3d   : > { %3216 = shalt.err (!%p3213_p1)
}
  0x3e   : > { %s3468_s0 = smov 64   ;;  %s3469_s21 = smov 4  }
  0x3f   : > { %3029 = dma.hbm_to_vmem [thread:$0]  (!%p3660_p12), %s4217_s19, 256, %s3656_s29, [#allocation6], %s3468_s0, %s3468_s0, %s3469_s21  }
  0x40   : > { %s4219_s6 = sld [smem:[#allocation31_spill]] }
  0x46   : > { %s3217_s25 = scalar_lea.hbm %s4219_s6, 16 }
  0x47   : > { %p3218_p6 = scmp.ne.s32.totalorder %s4219_s6, %s3217_s25  ;;  %p3224_p3 = scmp.lt.u32.totalorder %s3217_s25, %s4219_s6 }
  0x49   : > { %p3220_p9 = pnand %p3218_p6, %p3676_p0 }
  0x4b   : > { %p3221_p2 = pneg %p3220_p9 }
  0x4d   : > { %p3226_p4 = pnand %p3224_p3, %p3221_p2 }
  0x4f   : > { %3229 = shalt.err (!%p3226_p4)
}
  0x50   : > { %s3230_s29 = scalar_lea.vmem %s3664_s24, 16  ;;  %s3237_s17 = scalar_lea.vmem %s3664_s24, 32 }
  0x51   : > { %p3231_p7 = scmp.ne.s32.totalorder %s3664_s24, %s3230_s29  ;;  %p3238_p13 = scmp.lt.s32.totalorder %s3664_s24, %s3664_s24 }
  0x52   : > { %p3239_p1 = scmp.lt.s32.totalorder %s3237_s17, %s3230_s29 }
  0x53   : > { %p3233_p8 = pnand %p3231_p7, %p3676_p0 }
  0x54   : > { %p3240_p6 = por %p3239_p1, %p3238_p13 }
  0x55   : > { %p3234_p11 = pneg %p3233_p8 }
  0x57   : > { %p3241_p9 = pnand %p3240_p6, %p3234_p11 }
  0x59   : > { %3244 = shalt.err (!%p3241_p9)
}
  0x5a   : > { %3035 = dma.hbm_to_vmem [thread:$0]  (!%p3660_p12), %s4219_s6, 16, %s3664_s24, [#allocation9]  }
  0x5b   : > { %s3245_s28 = scalar_lea.hbm %s4167_s8, 256 }
  0x5c   : > { %p3246_p2 = scmp.ne.s32.totalorder %s4167_s8, %s3245_s28  ;;  %p3252_p7 = scmp.lt.u32.totalorder %s3245_s28, %s4167_s8 }
  0x5e   : > { %p3248_p3 = pnand %p3246_p2, %p3676_p0 }
  0x60   : > { %p3249_p4 = pneg %p3248_p3 }
  0x62   : > { %p3254_p8 = pnand %p3252_p7, %p3249_p4 }
  0x64   : > { %3257 = shalt.err (!%p3254_p8)
}
  0x65   : > { %s3258_s17 = scalar_lea.vmem %s555_s20, 256  ;;  %p3266_p6 = scmp.lt.s32.totalorder %s555_s20, %s555_s20 }
  0x66   : > { %p3259_p11 = scmp.ne.s32.totalorder %s555_s20, %s3258_s17  ;;  %p3267_p9 = scmp.lt.s32.totalorder %s3258_s17, %s3258_s17 }
  0x68   : > { %p3261_p13 = pnand %p3259_p11, %p3676_p0  ;;  %p3268_p5 = por %p3267_p9, %p3266_p6 }
  0x6a   : > { %p3262_p1 = pneg %p3261_p13 }
  0x6c   : > { %p3269_p10 = pnand %p3268_p5, %p3262_p1 }
  0x6e   : > { %3272 = shalt.err (!%p3269_p10)
}
  0x6f   : > { %3041 = dma.hbm_to_vmem [thread:$0]  (!%p3660_p12), %s4167_s8, 256, %s555_s20, [#allocation12], %s3468_s0, %s3468_s0, %s3469_s21  }
  0x70   : > { %s3470_s16 = smov [#allocation2]   ;;  %s3471_s26 = smov [#allocation7]  }
  0x71   : > { %s489_s2 = sshll.u32 %s3470_s16, 4  ;;  %s522_s28 = sshll.u32 %s3471_s26, 4  ;;  %s490_s2 = int_to_ptr.vmem [resolvable:$true] %s489_s2  ;;  %s523_s28 = int_to_ptr.vmem [resolvable:$true] %s522_s28 }
  0x72   : > { %s4220_s18 = sld [smem:[#allocation28_spill]] }
  0x78   : > { %s3273_s29 = scalar_lea.hbm %s4220_s18, 256 }
  0x79   : > { %p3274_p5 = scmp.ne.s32.totalorder %s4220_s18, %s3273_s29  ;;  %p3280_p3 = scmp.lt.u32.totalorder %s3273_s29, %s4220_s18 }
  0x7b   : > { %p3276_p10 = pnand %p3274_p5, %p3676_p0 }
  0x7d   : > { %p3277_p2 = pneg %p3276_p10 }
  0x7f   : > { %p3282_p4 = pnand %p3280_p3, %p3277_p2 }
  0x81   : > { %3285 = shalt.err (!%p3282_p4)
}
  0x82   : > { %s3286_s20 = scalar_lea.vmem %s490_s2, 256  ;;  %p3294_p13 = scmp.lt.s32.totalorder %s490_s2, %s490_s2 }
  0x83   : > { %p3287_p7 = scmp.ne.s32.totalorder %s490_s2, %s3286_s20  ;;  %p3295_p1 = scmp.lt.s32.totalorder %s3286_s20, %s3286_s20 }
  0x85   : > { %p3289_p8 = pnand %p3287_p7, %p3676_p0  ;;  %p3296_p6 = por %p3295_p1, %p3294_p13 }
  0x87   : > { %p3290_p11 = pneg %p3289_p8 }
  0x89   : > { %p3297_p9 = pnand %p3296_p6, %p3290_p11 }
  0x8b   : > { %3300 = shalt.err (!%p3297_p9)
}
  0x8c   : > { %3026 = dma.hbm_to_vmem [thread:$0]  (!%p3660_p12), %s4220_s18, 256, %s490_s2, [#allocation3], %s3468_s0, %s3468_s0, %s3469_s21  }
  0x8d   : > { %s3301_s26 = scalar_lea.hbm %s4164_s5, 16 }
  0x8e   : > { %p3302_p5 = scmp.ne.s32.totalorder %s4164_s5, %s3301_s26  ;;  %p3308_p3 = scmp.lt.u32.totalorder %s3301_s26, %s4164_s5 }
  0x90   : > { %p3304_p10 = pnand %p3302_p5, %p3676_p0 }
  0x92   : > { %p3305_p2 = pneg %p3304_p10 }
  0x94   : > { %p3310_p4 = pnand %p3308_p3, %p3305_p2 }
  0x96   : > { %3313 = shalt.err (!%p3310_p4)
}
  0x97   : > { %s3314_s24 = scalar_lea.vmem %s523_s28, 16  ;;  %s3321_s0 = scalar_lea.vmem %s523_s28, 32 }
  0x98   : > { %p3315_p7 = scmp.ne.s32.totalorder %s523_s28, %s3314_s24  ;;  %p3322_p13 = scmp.lt.s32.totalorder %s523_s28, %s523_s28 }
  0x99   : > { %p3323_p1 = scmp.lt.s32.totalorder %s3321_s0, %s3314_s24 }
  0x9a   : > { %p3317_p8 = pnand %p3315_p7, %p3676_p0 }
  0x9b   : > { %p3324_p6 = por %p3323_p1, %p3322_p13 }
  0x9c   : > { %p3318_p11 = pneg %p3317_p8 }
  0x9e   : > { %p3325_p9 = pnand %p3324_p6, %p3318_p11 }
  0xa0   : > { %3328 = shalt.err (!%p3325_p9)
}
  0xa1   : > { %3032 = dma.hbm_to_vmem [thread:$0]  (!%p3660_p12), %s4164_s5, 16, %s523_s28, [#allocation6]  }
  0xa2   : > { %s3472_s20 = smov [#allocation10]   ;;  %s3473_s19 = smov [#allocation13]  }
  0xa3   : > { %s544_s6 = sshll.u32 %s3472_s20, 4  ;;  %s568_s15 = sshll.u32 %s3473_s19, 4  ;;  %s545_s6 = int_to_ptr.vmem [resolvable:$true] %s544_s6  ;;  %s569_s15 = int_to_ptr.vmem [resolvable:$true] %s568_s15 }
  0xa4   : > { %s3329_s23 = scalar_lea.hbm %s4166_s7, 16 }
  0xa5   : > { %p3330_p5 = scmp.ne.s32.totalorder %s4166_s7, %s3329_s23  ;;  %p3336_p3 = scmp.lt.u32.totalorder %s3329_s23, %s4166_s7 }
  0xa7   : > { %p3332_p10 = pnand %p3330_p5, %p3676_p0 }
  0xa9   : > { %p3333_p2 = pneg %p3332_p10 }
  0xab   : > { %p3338_p4 = pnand %p3336_p3, %p3333_p2 }
  0xad   : > { %3341 = shalt.err (!%p3338_p4)
}
  0xae   : > { %s3342_s28 = scalar_lea.vmem %s545_s6, 16  ;;  %s3349_s0 = scalar_lea.vmem %s545_s6, 32 }
  0xaf   : > { %p3343_p7 = scmp.ne.s32.totalorder %s545_s6, %s3342_s28  ;;  %p3350_p13 = scmp.lt.s32.totalorder %s545_s6, %s545_s6 }
  0xb0   : > { %p3351_p1 = scmp.lt.s32.totalorder %s3349_s0, %s3342_s28 }
  0xb1   : > { %p3345_p8 = pnand %p3343_p7, %p3676_p0 }
  0xb2   : > { %p3352_p6 = por %p3351_p1, %p3350_p13 }
  0xb3   : > { %p3346_p11 = pneg %p3345_p8 }
  0xb5   : > { %p3353_p9 = pnand %p3352_p6, %p3346_p11 }
  0xb7   : > { %3356 = shalt.err (!%p3353_p9)
}
  0xb8   : > { %3038 = dma.hbm_to_vmem [thread:$0]  (!%p3660_p12), %s4166_s7, 16, %s545_s6, [#allocation9]  }
  0xb9   : > { %s3357_s16 = scalar_lea.hbm %s4168_s9, 16 }
  0xba   : > { %p3358_p5 = scmp.ne.s32.totalorder %s4168_s9, %s3357_s16  ;;  %p3364_p3 = scmp.lt.u32.totalorder %s3357_s16, %s4168_s9 }
  0xbc   : > { %p3360_p10 = pnand %p3358_p5, %p3676_p0 }
  0xbe   : > { %p3361_p2 = pneg %p3360_p10 }
  0xc0   : > { %p3366_p4 = pnand %p3364_p3, %p3361_p2 }
  0xc2   : > { %3369 = shalt.err (!%p3366_p4)
}
  0xc3   : > { %s3370_s17 = scalar_lea.vmem %s569_s15, 16  ;;  %s3377_s6 = scalar_lea.vmem %s569_s15, 32 }
  0xc4   : > { %p3371_p7 = scmp.ne.s32.totalorder %s569_s15, %s3370_s17  ;;  %p3378_p13 = scmp.lt.s32.totalorder %s569_s15, %s569_s15 }
  0xc5   : > { %p3379_p1 = scmp.lt.s32.totalorder %s3377_s6, %s3370_s17 }
  0xc6   : > { %p3373_p8 = pnand %p3371_p7, %p3676_p0 }
  0xc7   : > { %p3380_p6 = por %p3379_p1, %p3378_p13 }
  0xc8   : > { %p3374_p11 = pneg %p3373_p8 }
  0xca   : > { %p3381_p9 = pnand %p3380_p6, %p3374_p11 }
  0xcc   : > { %3384 = shalt.err (!%p3381_p9)
}
  0xcd   : > { %3044 = dma.hbm_to_vmem [thread:$0]  (!%p3660_p12), %s4168_s9, 16, %s569_s15, [#allocation12]  }
  0xce   : > { %p4221_p5 = scmp.ne.s32.totalorder %s4214_s27, 0 }
  0xcf   : > { %p4222_p10 = scmp.eq.s32.totalorder (!%p4221_p5), %s3622_s1, 0 }
  0xd0   : > { %612 = sbr.rel (%p4221_p5) target bundleno = 6947 (0x1b23), region = 92 }
  0xd7   : > { %3430 = dma.done.wait (%p4222_p10), [#allocation3], 256   ;;  %p4223_p0 = pmov %p4222_p10 }
  0xd9   : > { %3432 = vsyncadd (%p4223_p0), [#allocation3], 4294967040  ;;  %p4224_p2 = pmov %p4223_p0 }
  0xda   : > { %p4225_p3 = pmov %p4223_p0 }
  0xdb   : > { %3434 = dma.done.wait (%p4224_p2), [#allocation6], 272  }
  0xdc   : > { %3436 = vsyncadd (%p4225_p3), [#allocation6], 4294967024  ;;  %p4226_p4 = pmov %p4223_p0 }
  0xdd   : > { %p4227_p12 = pmov %p4223_p0 }
  0xde   : > { %3438 = dma.done.wait (%p4226_p4), [#allocation9], 32  }
  0xdf   : > { %3440 = vsyncadd (%p4227_p12), [#allocation9], 4294967264  ;;  %p4228_p7 = pmov %p4223_p0 }
  0xe0   : > { %p4229_p8 = pmov %p4223_p0 }
  0xe1   : > { %3442 = dma.done.wait (%p4228_p7), [#allocation12], 272  }
  0xe2   : > { %3444 = vsyncadd (%p4229_p8), [#allocation12], 4294967024  ;;  %p694_p11 = scmp.lt.s32.totalorder %s3622_s1, 1  ;;  %v3474_v0 = vmov 0.0   ;;  %vm3475_vm0 = vmmov 0   ;;  %s4230_s0 = sld [smem:[#allocation27_spill]] }
  0xe3   : > { %2801 = vmatprep.subr.bf16.mxu0 %v3474_v0  ;;  %2805 = vmatprep.mubr.msk.bf16.mxu0 %vm3475_vm0, %v3474_v0  ;;  %v3131_v1 = vld [vmem:[#allocation2] sm:$0xff]   ;;  %v3132_v2 = vld [vmem:[#allocation2 + $0x8] sm:$0xff]   ;;  %vm727_vm1 = vcmask 261120   ;;  %s4231_s19 = sld [smem:[#allocation29_spill]]  ;;  %s3476_s16 = smov 124   ;;  %vm775_vm2 = vcmask 31744  }
  0xe4   : > { %s3844_s3 = scalar_select %p694_p11, %s3622_s1, 1  ;;  %2809 = vmatprep.subr.bf16.mxu1 %v3474_v0  ;;  %2811 = vmatprep.mubr.msk.bf16.mxu1 %vm3475_vm0, %v3474_v0  ;;  %vm823_vm3 = vcmask 64512   ;;  %vm841_vm4 = vcmask 1043456   ;;  %v3133_v51 = vld [vmem:[#allocation5] ss:$0 sps:$4 sm:$0xcc]  }
  0xe5   : > { %2802 = vmatpush3.bf16.msra.mxu0 %v3131_v1  ;;  %s3477_s26 = smov 96   ;;  %s3478_s23 = smov 92   ;;  %v886_v52 = vld [vmem:[#allocation5] sm:$0x3]  ;;  %vm1007_vm5 = vcmask 1041408   ;;  %v1003_v54 = vrot.slane %v3133_v51, 2 }
  0xe6   : > { %s2671_s27 = sshll.u32 %s3844_s3, 3  ;;  %2803 = vmatprep.subr.bf16.mxu0 %v3474_v0  ;;  %s3479_s25 = smov 64   ;;  %v1055_v53 = vsel %vm1007_vm5, %v886_v52, 0  ;;  %vm2224_vm6 = vcmask 523264   ;;  %vm2458_vm7 = vcmask 23552   ;;  %vm2471_vm10 = vcmask 31768  }
  0xe7   : > { %s3480_s29 = smov 60   ;;  %s3481_s17 = smov 120   ;;  %v1009_v55 = vsel %vm1007_vm5, %v1003_v54, 0 }
  0xe8   : > { %s697_s21 = scalar_lea.vmem %s4230_s0, %s2671_s27  ;;  %s3482_s6 = smov 88  }
  0xe9   : > { %v3853_v3 = vld [vmem:[%s697_s21] sm:$0xff]  ;;  %2804 = vmatpush3.bf16.msra.mxu0 %v3132_v2  ;;  %s3483_s24 = smov 84   ;;  %s3484_s28 = smov 116  }
  0xea   : > { %v703_v4 = vpack.c.bf16 %v3853_v3, %v3853_v3  ;;  %2815 = vmatprep.subr.bf16.mxu0 %v3474_v0  ;;  %v2672_v5 = vld [vmem:[%s4231_s19] ss:$0 sm:$0xff]  ;;  %s3485_s27 = smov 56   ;;  %s3486_s22 = smov 52  }
  0xeb   : > { %s3487_s15 = smov 112   ;;  %s3488_s0 = smov 80  }
  0xec   : > { %2806 = vmatmul.mubr.msk.bf16.vlgmr.msra.gmra.mrb[0].mxu0 %vm727_vm1, %v703_v4  ;;  %s3489_s21 = smov 76   ;;  %s3490_s2 = smov 108  }
  0xed   : > { %2817 = vmatprep.mubr.msk.bf16.mxu0 %vm3475_vm0, %v3474_v0  ;;  %s3491_s20 = smov 48   ;;  %s3492_s19 = smov 44  }
 0x1bf   : > { %v765_v6 = vpop.f32.mrb[0].mxu0 }
 0x1c0   : > { %v766_v7 = vadd.f32 %v2672_v5, %v765_v6  ;;  %v2807_v8 = vpop.f32.mrb[1].mxu0 }
 0x1c1   : > { %v768_v9 = vpop.f32.mrb[2].mxu0 }
 0x1c2   : > { %v3865_v10 = vpack.c.bf16 %v766_v7, %v766_v7  ;;  %v2808_v11 = vpop.f32.mrb[3].mxu0 }
 0x1c4   : > { %887 = vrot.lane.b32.xlu1 %v3865_v10, %s3476_s16  ;;  %773 = vrot.lane.b32.xlu0 %v3865_v10, %s3477_s26  ;;  %s3493_s16 = smov 104   ;;  %s3494_s26 = smov 72  }
 0x1c8   : > { %889 = vrot.lane.b32.xlu0 %v3865_v10, %s3478_s23  ;;  %s3495_s23 = smov 68  }
 0x236   : > { %v774_v12 = vpop.permute.xlu0 %773  ;;  %v888_v16 = vpop.permute.xlu1 %887 }
 0x237   : > { %v780_v13 = vsel %vm775_vm2, %v774_v12, 0 }
 0x238   : > { %2810 = vmatpush3.bf16.xpose.msra.mxu1 %v780_v13 }
 0x239   : > { %2821 = vmatprep.subr.bf16.mxu1 %v3474_v0 }
 0x23a   : > { %v890_v14 = vpop.permute.xlu0 %889 }
 0x23b   : > { %v895_v15 = vsel %vm775_vm2, %v890_v14, 0 }
 0x23f   : > { %2812 = vmatmul.mubr.msk.bf16.vlgmr.msra.gmra.mrb[0].mxu1 %vm775_vm2, %v3865_v10 }
 0x240   : > { %2822 = vmatpush3.bf16.xpose.msra.mxu1 %v895_v15  ;;  %2823 = vmatprep.mubr.msk.bf16.mxu1 %vm3475_vm0, %v3474_v0 }
 0x241   : > { %2833 = vmatprep.subr.bf16.mxu1 %v3474_v0 }
 0x247   : > { %2824 = vmatmul.mubr.msk.bf16.vlgmr.msra.gmra.mrb[4].mxu1 %vm775_vm2, %v888_v16 }
 0x248   : > { %2835 = vmatprep.mubr.msk.bf16.mxu1 %vm3475_vm0, %v3474_v0  ;;  %2834 = vmatpush3.bf16.msra.mxu1 %v1009_v55 }
 0x249   : > { %2845 = vmatprep.subr.bf16.mxu1 %v3474_v0 }
 0x312   : > { %v816_v17 = vpop.f32.mrb[0].mxu1 }
 0x313   : > { %v822_v18 = vmul.f32 0.5, %v816_v17  ;;  %v2813_v19 = vpop.f32.mrb[1].mxu1 }
 0x314   : > { %v819_v20 = vpop.f32.mrb[2].mxu1 }
 0x315   : > { %v2814_v21 = vpop.f32.mrb[3].mxu1  ;;  %v824_v22 = vsel %vm823_vm3, %v822_v18, -inf }
 0x316   : > { %825 = vmax.xlane.f32.xlu1 %v824_v22 }
 0x31a   : > { %v931_v23 = vpop.f32.mrb[4].mxu1 }
 0x31b   : > { %v937_v24 = vmul.f32 0.5, %v931_v23  ;;  %v2825_v25 = vpop.f32.mrb[5].mxu1 }
 0x31c   : > { %v934_v26 = vpop.f32.mrb[6].mxu1 }
 0x31d   : > { %v2826_v27 = vpop.f32.mrb[7].mxu1  ;;  %v938_v28 = vsel %vm823_vm3, %v937_v24, -inf }
 0x31e   : > { %939 = vmax.xlane.f32.xlu0 %v938_v28 }
 0x3a3   : > { %v826_v29 = vpop.xlane.xlu1 %825 }
 0x3a4   : > { %v827_v30 = vsub.f32 %v822_v18, %v826_v29 }
 0x3a6   : > { %v828_v31 = vmul.f32 1.442695, %v827_v30 }
 0x3a8   : > { %3149 = vpow2.f32 %v828_v31 }
 0x3ab   : > { %v940_v32 = vpop.xlane.xlu0 %939 }
 0x3ac   : > { %v941_v33 = vsub.f32 %v937_v24, %v940_v32 }
 0x3ae   : > { %v942_v34 = vmul.f32 1.442695, %v941_v33 }
 0x3b0   : > { %3151 = vpow2.f32 %v942_v34 }
 0x3b2   : > { %v3150_v35 = vpop.eup %3149 }
 0x3b3   : > { %v830_v36 = vsel %vm823_vm3, %v3150_v35, 0.0 }
 0x3b4   : > { %831 = vadd.xlane.f32.xlu0 %v830_v36 }
 0x3ba   : > { %v3152_v37 = vpop.eup %3151 }
 0x3bb   : > { %v944_v38 = vsel %vm823_vm3, %v3152_v37, 0.0 }
 0x3bc   : > { %945 = vadd.xlane.f32.xlu1 %v944_v38 }
 0x3ca   : > { %836 = vrot.lane.b32.xlu0 %v3865_v10, %s3479_s25  ;;  %s3496_s25 = smov 100  }
 0x3cd   : > { %950 = vrot.lane.b32.xlu1 %v3865_v10, %s3480_s29  ;;  %s3497_s29 = smov 40  }
 0x3ce   : > { %1097 = vrot.lane.b32.xlu0 %v3865_v10, %s3481_s17  ;;  %s3498_s17 = smov 36  }
 0x3d1   : > { %1099 = vrot.lane.b32.xlu1 %v3865_v10, %s3482_s6 }
 0x441   : > { %v832_v39 = vpop.xlane.xlu0 %831 }
 0x442   : > { %3153 = vrcp.f32 %v832_v39 }
 0x445   : > { %v837_v40 = vpop.permute.xlu0 %836 }
 0x446   : > { %v843_v41 = vsel %vm841_vm4, %v837_v40, 0 }
 0x447   : > { %2816 = vmatpush3.bf16.msra.mxu0 %v843_v41 }
 0x448   : > { %2827 = vmatprep.subr.bf16.mxu0 %v3474_v0 }
 0x449   : > { %v946_v42 = vpop.xlane.xlu1 %945  ;;  %v1098_v6 = vpop.permute.xlu0 %1097 }
 0x44a   : > { %3155 = vrcp.f32 %v946_v42 }
 0x44c   : > { %v3154_v43 = vpop.eup %3153 }
 0x44d   : > { %v834_v44 = vmul.f32 %v3154_v43, %v3150_v35  ;;  %v951_v45 = vpop.permute.xlu1 %950 }
 0x44e   : > { %v956_v47 = vsel %vm841_vm4, %v951_v45, 0 }
 0x44f   : > { %v835_v46 = vpack.c.bf16 %v834_v44, %v834_v44 }
 0x451   : > { %2818 = vmatmul.mubr.msk.bf16.vlgmr.msra.gmra.mrb[4].mxu0 %vm823_vm3, %v835_v46  ;;  %v1100_v61 = vpop.permute.xlu1 %1099 }
 0x452   : > { %2828 = vmatpush3.bf16.msra.mxu0 %v956_v47  ;;  %2829 = vmatprep.mubr.msk.bf16.mxu0 %vm3475_vm0, %v3474_v0  ;;  %v1105_v4 = vsel %vm775_vm2, %v1100_v61, 0 }
 0x453   : > { %2839 = vmatprep.subr.bf16.mxu0 %v3474_v0 }
 0x454   : > { %v3156_v48 = vpop.eup %3155 }
 0x455   : > { %v948_v49 = vmul.f32 %v3156_v48, %v3152_v37  ;;  %v1209_v37 = vld [vmem:[#allocation5 + $0x4] sm:$0x3] }
 0x456   : > { %v1214_v38 = vsel %vm1007_vm5, %v1209_v37, 0 }
 0x457   : > { %v949_v50 = vpack.c.bf16 %v948_v49, %v948_v49 }
 0x459   : > { %2830 = vmatmul.mubr.msk.bf16.vlgmr.msra.gmra.mrb[8].mxu0 %vm823_vm3, %v949_v50 }
 0x45a   : > { %2841 = vmatprep.mubr.msk.bf16.mxu0 %vm3475_vm0, %v3474_v0  ;;  %2840 = vmatpush3.bf16.msra.mxu0 %v1055_v53 }
 0x45b   : > { %2851 = vmatprep.subr.bf16.mxu0 %v3474_v0 }
 0x524   : > { %v879_v56 = vpop.f32.mrb[4].mxu0 }
 0x525   : > { %v885_v57 = vpack.c.bf16 %v879_v56, %v879_v56  ;;  %v2819_v58 = vpop.f32.mrb[5].mxu0 }
 0x526   : > { %v882_v59 = vpop.f32.mrb[6].mxu0 }
 0x527   : > { %v2820_v60 = vpop.f32.mrb[7].mxu0  ;;  %2842 = vmatmul.mubr.msk.bf16.vlgmr.msra.gmra.mrb[12].mxu0 %vm775_vm2, %v885_v57 }
 0x528   : > { %2853 = vmatprep.mubr.msk.bf16.mxu0 %vm3475_vm0, %v3474_v0 }
 0x52c   : > { %v992_v62 = vpop.f32.mrb[8].mxu0 }
 0x52d   : > { %v998_v63 = vpack.c.bf16 %v992_v62, %v992_v62  ;;  %v2831_v1 = vpop.f32.mrb[9].mxu0 }
 0x52e   : > { %v995_v2 = vpop.f32.mrb[10].mxu0 }
 0x52f   : > { %v2832_v5 = vpop.f32.mrb[11].mxu0  ;;  %2836 = vmatmul.mubr.msk.bf16.vlgmr.msra.gmra.mrb[8].mxu1 %vm775_vm2, %v998_v63 }
 0x530   : > { %2846 = vmatpush3.bf16.xpose.msra.mxu1 %v1105_v4  ;;  %2847 = vmatprep.mubr.msk.bf16.mxu1 %vm3475_vm0, %v3474_v0 }
 0x531   : > { %2857 = vmatprep.subr.bf16.mxu1 %v3474_v0 }
 0x537   : > { %2848 = vmatmul.mubr.msk.bf16.vlgmr.msra.gmra.mrb[12].mxu1 %vm775_vm2, %v1098_v6 }
 0x538   : > { %2859 = vmatprep.mubr.msk.bf16.mxu1 %vm3475_vm0, %v3474_v0  ;;  %2858 = vmatpush3.bf16.msra.mxu1 %v1214_v38 }
 0x539   : > { %2869 = vmatprep.subr.bf16.mxu1 %v3474_v0 }
 0x5fa   : > { %v1091_v7 = vpop.f32.mrb[12].mxu0 }
 0x5fb   : > { %v2843_v8 = vpop.f32.mrb[13].mxu0 }
 0x5fc   : > { %v1094_v9 = vpop.f32.mrb[14].mxu0 }
 0x5fd   : > { %v2844_v11 = vpop.f32.mrb[15].mxu0 }
 0x602   : > { %v1045_v12 = vpop.f32.mrb[8].mxu1 }
 0x603   : > { %v3914_v13 = vadd.f32 %v1091_v7, %v1045_v12  ;;  %v2837_v14 = vpop.f32.mrb[9].mxu1  ;;  %v3134_v7 = vld [vmem:[#allocation5 + $0x4] ss:$0 sps:$4 sm:$0xcc]  }
 0x604   : > { %v1048_v15 = vpop.f32.mrb[10].mxu1  ;;  %v1373_v8 = vrot.slane %v3134_v7, 2 }
 0x605   : > { %v2838_v16 = vpop.f32.mrb[11].mxu1 }
 0x606   : > { %v1378_v9 = vsel %vm1007_vm5, %v1373_v8, 0 }
 0x60a   : > { %v1141_v17 = vpop.f32.mrb[12].mxu1 }
 0x60b   : > { %v1147_v18 = vmul.f32 0.5, %v1141_v17  ;;  %v2849_v19 = vpop.f32.mrb[13].mxu1 }
 0x60c   : > { %v1144_v20 = vpop.f32.mrb[14].mxu1 }
 0x60d   : > { %v2850_v21 = vpop.f32.mrb[15].mxu1  ;;  %v1148_v22 = vsel %vm823_vm3, %v1147_v18, -inf }
 0x60e   : > { %1149 = vmax.xlane.f32.xlu1 %v1148_v22 }
 0x61f   : > { %1259 = vrot.lane.b32.xlu1 %v3865_v10, %s3483_s24 }
 0x623   : > { %1257 = vrot.lane.b32.xlu1 %v3865_v10, %s3484_s28 }
 0x69b   : > { %v1150_v23 = vpop.xlane.xlu1 %1149 }
 0x69c   : > { %v1151_v24 = vsub.f32 %v1147_v18, %v1150_v23 }
 0x69e   : > { %v1152_v25 = vmul.f32 1.442695, %v1151_v24 }
 0x69f   : > { %v1260_v33 = vpop.permute.xlu1 %1259 }
 0x6a0   : > { %3157 = vpow2.f32 %v1152_v25  ;;  %v1265_v35 = vsel %vm775_vm2, %v1260_v33, 0 }
 0x6a3   : > { %v1258_v36 = vpop.permute.xlu1 %1257 }
 0x6aa   : > { %v3158_v26 = vpop.eup %3157 }
 0x6ab   : > { %v1154_v27 = vsel %vm823_vm3, %v3158_v26, 0.0 }
 0x6ac   : > { %1155 = vadd.xlane.f32.xlu0 %v1154_v27 }
 0x6c2   : > { %1160 = vrot.lane.b32.xlu0 %v3865_v10, %s3485_s27  ;;  %s4234_s27 = sld [smem:[#allocation32_spill]] }
 0x739   : > { %v1156_v28 = vpop.xlane.xlu0 %1155 }
 0x73a   : > { %3159 = vrcp.f32 %v1156_v28 }
 0x73d   : > { %v1161_v29 = vpop.permute.xlu0 %1160 }
 0x73e   : > { %v1166_v30 = vsel %vm841_vm4, %v1161_v29, 0 }
 0x73f   : > { %2852 = vmatpush3.bf16.msra.mxu0 %v1166_v30 }
 0x740   : > { %2863 = vmatprep.subr.bf16.mxu0 %v3474_v0 }
 0x744   : > { %v3160_v31 = vpop.eup %3159 }
 0x745   : > { %v1158_v32 = vmul.f32 %v3160_v31, %v3158_v26 }
 0x747   : > { %v1159_v34 = vpack.c.bf16 %v1158_v32, %v1158_v32 }
 0x749   : > { %2854 = vmatmul.mubr.msk.bf16.vlgmr.msra.gmra.mrb[16].mxu0 %vm823_vm3, %v1159_v34 }
 0x74a   : > { %2864 = vmatpush3.bf16.xpose.msra.mxu0 %v1265_v35  ;;  %2865 = vmatprep.mubr.msk.bf16.mxu0 %vm3475_vm0, %v3474_v0 }
 0x74b   : > { %2875 = vmatprep.subr.bf16.mxu0 %v3474_v0 }
 0x751   : > { %2866 = vmatmul.mubr.msk.bf16.vlgmr.msra.gmra.mrb[20].mxu0 %vm775_vm2, %v1258_v36 }
 0x752   : > { %2877 = vmatprep.mubr.msk.bf16.mxu0 %vm3475_vm0, %v3474_v0  ;;  %2876 = vmatpush3.bf16.msra.mxu0 %v1378_v9 }
 0x753   : > { %2887 = vmatprep.subr.bf16.mxu0 %v3474_v0 }
 0x81c   : > { %v1202_v39 = vpop.f32.mrb[16].mxu0 }
 0x81d   : > { %v1208_v40 = vpack.c.bf16 %v1202_v39, %v1202_v39  ;;  %v2855_v41 = vpop.f32.mrb[17].mxu0 }
 0x81e   : > { %v1205_v42 = vpop.f32.mrb[18].mxu0  ;;  %v1533_v41 = vld [vmem:[#allocation5 + $0x8] sm:$0x3] }
 0x81f   : > { %v2856_v43 = vpop.f32.mrb[19].mxu0  ;;  %2860 = vmatmul.mubr.msk.bf16.vlgmr.msra.gmra.mrb[16].mxu1 %vm775_vm2, %v1208_v40  ;;  %v1538_v42 = vsel %vm1007_vm5, %v1533_v41, 0 }
 0x820   : > { %2871 = vmatprep.mubr.msk.bf16.mxu1 %vm3475_vm0, %v3474_v0 }
 0x824   : > { %v1301_v44 = vpop.f32.mrb[20].mxu0 }
 0x825   : > { %v1307_v45 = vmul.f32 0.5, %v1301_v44  ;;  %v2867_v46 = vpop.f32.mrb[21].mxu0 }
 0x826   : > { %v1304_v47 = vpop.f32.mrb[22].mxu0 }
 0x827   : > { %v2868_v48 = vpop.f32.mrb[23].mxu0  ;;  %v1308_v49 = vsel %vm823_vm3, %v1307_v45, -inf }
 0x828   : > { %1309 = vmax.xlane.f32.xlu0 %v1308_v49 }
 0x83e   : > { %1320 = vrot.lane.b32.xlu0 %v3865_v10, %s3486_s22 }
 0x842   : > { %1421 = vrot.lane.b32.xlu0 %v3865_v10, %s3487_s15 }
 0x8b5   : > { %v1310_v50 = vpop.xlane.xlu0 %1309 }
 0x8b6   : > { %v1311_v51 = vsub.f32 %v1307_v45, %v1310_v50 }
 0x8b8   : > { %v1312_v52 = vmul.f32 1.442695, %v1311_v51 }
 0x8b9   : > { %v1321_v53 = vpop.permute.xlu0 %1320 }
 0x8ba   : > { %3161 = vpow2.f32 %v1312_v52  ;;  %v1326_v54 = vsel %vm841_vm4, %v1321_v53, 0 }
 0x8bb   : > { %2870 = vmatpush3.bf16.msra.mxu1 %v1326_v54 }
 0x8bc   : > { %2881 = vmatprep.subr.bf16.mxu1 %v3474_v0 }
 0x8bd   : > { %v1422_v6 = vpop.permute.xlu0 %1421 }
 0x8c4   : > { %v3162_v55 = vpop.eup %3161 }
 0x8c5   : > { %v1314_v56 = vsel %vm823_vm3, %v3162_v55, 0.0 }
 0x8c6   : > { %1315 = vadd.xlane.f32.xlu1 %v1314_v56 }
 0x8d7   : > { %1423 = vrot.lane.b32.xlu1 %v3865_v10, %s3488_s0  ;;  %s4235_s0 = sld [smem:[#allocation34_spill]] }
 0x8f2   : > { %v1250_v57 = vpop.f32.mrb[16].mxu1 }
 0x8f3   : > { %v1256_v58 = vadd.f32 %v1250_v57, %v3914_v13  ;;  %v2861_v59 = vpop.f32.mrb[17].mxu1 }
 0x8f4   : > { %v1253_v60 = vpop.f32.mrb[18].mxu1 }
 0x8f5   : > { %v2862_v61 = vpop.f32.mrb[19].mxu1 }
 0x953   : > { %v1316_v62 = vpop.xlane.xlu1 %1315 }
 0x954   : > { %3163 = vrcp.f32 %v1316_v62 }
 0x957   : > { %v1424_v2 = vpop.permute.xlu1 %1423 }
 0x958   : > { %v1429_v5 = vsel %vm775_vm2, %v1424_v2, 0 }
 0x95e   : > { %v3164_v63 = vpop.eup %3163 }
 0x95f   : > { %v1318_v1 = vmul.f32 %v3164_v63, %v3162_v55 }
 0x961   : > { %v1319_v4 = vpack.c.bf16 %v1318_v1, %v1318_v1 }
 0x963   : > { %2872 = vmatmul.mubr.msk.bf16.vlgmr.msra.gmra.mrb[20].mxu1 %vm823_vm3, %v1319_v4 }
 0x964   : > { %2882 = vmatpush3.bf16.xpose.msra.mxu1 %v1429_v5  ;;  %2883 = vmatprep.mubr.msk.bf16.mxu1 %vm3475_vm0, %v3474_v0 }
 0x965   : > { %2893 = vmatprep.subr.bf16.mxu1 %v3474_v0 }
 0x96b   : > { %2884 = vmatmul.mubr.msk.bf16.vlgmr.msra.gmra.mrb[24].mxu1 %vm775_vm2, %v1422_v6 }
 0x96c   : > { %2895 = vmatprep.mubr.msk.bf16.mxu1 %vm3475_vm0, %v3474_v0  ;;  %2894 = vmatpush3.bf16.msra.mxu1 %v1538_v42 }
 0x96d   : > { %2905 = vmatprep.subr.bf16.mxu1 %v3474_v0 }
 0xa36   : > { %v1362_v11 = vpop.f32.mrb[20].mxu1 }
 0xa37   : > { %v1368_v12 = vpack.c.bf16 %v1362_v11, %v1362_v11  ;;  %v2873_v13 = vpop.f32.mrb[21].mxu1 }
 0xa38   : > { %v1365_v14 = vpop.f32.mrb[22].mxu1 }
 0xa39   : > { %v2874_v15 = vpop.f32.mrb[23].mxu1  ;;  %2878 = vmatmul.mubr.msk.bf16.vlgmr.msra.gmra.mrb[24].mxu0 %vm775_vm2, %v1368_v12  ;;  %v3135_v12 = vld [vmem:[#allocation5 + $0x8] ss:$0 sps:$4 sm:$0xcc]  }
 0xa3a   : > { %2889 = vmatprep.mubr.msk.bf16.mxu0 %vm3475_vm0, %v3474_v0  ;;  %v1697_v13 = vrot.slane %v3135_v12, 2 }
 0xa3c   : > { %v1702_v14 = vsel %vm1007_vm5, %v1697_v13, 0 }
 0xa3e   : > { %v1465_v16 = vpop.f32.mrb[24].mxu1 }
 0xa3f   : > { %v1471_v17 = vmul.f32 0.5, %v1465_v16  ;;  %v2885_v18 = vpop.f32.mrb[25].mxu1 }
 0xa40   : > { %v1468_v19 = vpop.f32.mrb[26].mxu1 }
 0xa41   : > { %v2886_v20 = vpop.f32.mrb[27].mxu1  ;;  %v1472_v21 = vsel %vm823_vm3, %v1471_v17, -inf }
 0xa42   : > { %1473 = vmax.xlane.f32.xlu1 %v1472_v21 }
 0xa53   : > { %1583 = vrot.lane.b32.xlu1 %v3865_v10, %s3489_s21  ;;  %s4232_s21 = sld [smem:[#allocation33_spill]] }
 0xa57   : > { %1581 = vrot.lane.b32.xlu1 %v3865_v10, %s3490_s2 }
 0xa59   : > { %s4233_s2 = smov %s4232_s21 }
 0xacf   : > { %v1474_v22 = vpop.xlane.xlu1 %1473 }
 0xad0   : > { %v1475_v23 = vsub.f32 %v1471_v17, %v1474_v22 }
 0xad2   : > { %v1476_v24 = vmul.f32 1.442695, %v1475_v23 }
 0xad3   : > { %v1584_v37 = vpop.permute.xlu1 %1583 }
 0xad4   : > { %3165 = vpow2.f32 %v1476_v24  ;;  %v1589_v39 = vsel %vm775_vm2, %v1584_v37, 0 }
 0xad7   : > { %v1582_v40 = vpop.permute.xlu1 %1581 }
 0xade   : > { %v3166_v25 = vpop.eup %3165 }
 0xadf   : > { %v1478_v26 = vsel %vm823_vm3, %v3166_v25, 0.0 }
 0xae0   : > { %1479 = vadd.xlane.f32.xlu0 %v1478_v26 }
 0xaf6   : > { %1484 = vrot.lane.b32.xlu0 %v3865_v10, %s3491_s20 }
 0xb0c   : > { %v1414_v27 = vpop.f32.mrb[24].mxu0 }
 0xb0d   : > { %v1420_v28 = vadd.f32 %v1414_v27, %v1256_v58  ;;  %v2879_v29 = vpop.f32.mrb[25].mxu0 }
 0xb0e   : > { %v1417_v30 = vpop.f32.mrb[26].mxu0 }
 0xb0f   : > { %v2880_v31 = vpop.f32.mrb[27].mxu0 }
 0xb6d   : > { %v1480_v32 = vpop.xlane.xlu0 %1479 }
 0xb6e   : > { %3167 = vrcp.f32 %v1480_v32 }
 0xb71   : > { %v1485_v33 = vpop.permute.xlu0 %1484 }
 0xb72   : > { %v1490_v34 = vsel %vm841_vm4, %v1485_v33, 0 }
 0xb73   : > { %2888 = vmatpush3.bf16.msra.mxu0 %v1490_v34 }
 0xb74   : > { %2899 = vmatprep.subr.bf16.mxu0 %v3474_v0 }
 0xb78   : > { %v3168_v35 = vpop.eup %3167 }
 0xb79   : > { %v1482_v36 = vmul.f32 %v3168_v35, %v3166_v25 }
 0xb7b   : > { %v1483_v38 = vpack.c.bf16 %v1482_v36, %v1482_v36 }
 0xb7d   : > { %2890 = vmatmul.mubr.msk.bf16.vlgmr.msra.gmra.mrb[28].mxu0 %vm823_vm3, %v1483_v38 }
 0xb7e   : > { %2900 = vmatpush3.bf16.xpose.msra.mxu0 %v1589_v39  ;;  %2901 = vmatprep.mubr.msk.bf16.mxu0 %vm3475_vm0, %v3474_v0 }
 0xb7f   : > { %2911 = vmatprep.subr.bf16.mxu0 %v3474_v0 }
 0xb85   : > { %2902 = vmatmul.mubr.msk.bf16.vlgmr.msra.gmra.mrb[32].mxu0 %vm775_vm2, %v1582_v40 }
 0xb86   : > { %2913 = vmatprep.mubr.msk.bf16.mxu0 %vm3475_vm0, %v3474_v0  ;;  %2912 = vmatpush3.bf16.msra.mxu0 %v1702_v14 }
 0xb87   : > { %2923 = vmatprep.subr.bf16.mxu0 %v3474_v0 }
 0xc50   : > { %v1526_v43 = vpop.f32.mrb[28].mxu0 }
 0xc51   : > { %v1532_v44 = vpack.c.bf16 %v1526_v43, %v1526_v43  ;;  %v2891_v45 = vpop.f32.mrb[29].mxu0 }
 0xc52   : > { %v1529_v46 = vpop.f32.mrb[30].mxu0  ;;  %v1857_v45 = vld [vmem:[#allocation5 + $0xc] sm:$0x3] }
 0xc53   : > { %v2892_v47 = vpop.f32.mrb[31].mxu0  ;;  %2896 = vmatmul.mubr.msk.bf16.vlgmr.msra.gmra.mrb[28].mxu1 %vm775_vm2, %v1532_v44  ;;  %v1862_v46 = vsel %vm1007_vm5, %v1857_v45, 0  ;;  %v2707_v45 = vld [vmem:[#allocation10] ss:$0 sm:$0xff] }
 0xc54   : > { %2907 = vmatprep.mubr.msk.bf16.mxu1 %vm3475_vm0, %v3474_v0 }
 0xc58   : > { %v1625_v48 = vpop.f32.mrb[32].mxu0 }
 0xc59   : > { %v1631_v49 = vmul.f32 0.5, %v1625_v48  ;;  %v2903_v50 = vpop.f32.mrb[33].mxu0 }
 0xc5a   : > { %v1628_v51 = vpop.f32.mrb[34].mxu0 }
 0xc5b   : > { %v2904_v52 = vpop.f32.mrb[35].mxu0  ;;  %v1632_v53 = vsel %vm823_vm3, %v1631_v49, -inf }
 0xc5c   : > { %1633 = vmax.xlane.f32.xlu0 %v1632_v53 }
 0xc72   : > { %1644 = vrot.lane.b32.xlu0 %v3865_v10, %s3492_s19  ;;  %s2731_s19 = sshll.u32 %s3622_s1, 7 }
 0xc76   : > { %1745 = vrot.lane.b32.xlu0 %v3865_v10, %s3493_s16 }
 0xce9   : > { %v1634_v54 = vpop.xlane.xlu0 %1633 }
 0xcea   : > { %v1635_v55 = vsub.f32 %v1631_v49, %v1634_v54 }
 0xcec   : > { %v1636_v56 = vmul.f32 1.442695, %v1635_v55 }
 0xced   : > { %v1645_v57 = vpop.permute.xlu0 %1644 }
 0xcee   : > { %3169 = vpow2.f32 %v1636_v56  ;;  %v1650_v58 = vsel %vm841_vm4, %v1645_v57, 0 }
 0xcef   : > { %2906 = vmatpush3.bf16.msra.mxu1 %v1650_v58 }
 0xcf0   : > { %2917 = vmatprep.subr.bf16.mxu1 %v3474_v0 }
 0xcf1   : > { %v1746_v11 = vpop.permute.xlu0 %1745 }
 0xcf8   : > { %v3170_v59 = vpop.eup %3169 }
 0xcf9   : > { %v1638_v60 = vsel %vm823_vm3, %v3170_v59, 0.0 }
 0xcfa   : > { %1639 = vadd.xlane.f32.xlu1 %v1638_v60 }
 0xd0b   : > { %1747 = vrot.lane.b32.xlu1 %v3865_v10, %s3494_s26 }
 0xd26   : > { %v1574_v61 = vpop.f32.mrb[28].mxu1 }
 0xd27   : > { %v1580_v62 = vadd.f32 %v1574_v61, %v1420_v28  ;;  %v2897_v63 = vpop.f32.mrb[29].mxu1 }
 0xd28   : > { %v1577_v1 = vpop.f32.mrb[30].mxu1 }
 0xd29   : > { %v2898_v2 = vpop.f32.mrb[31].mxu1 }
 0xd2a   : > { %v3136_v2 = vld [vmem:[#allocation5 + $0xc] ss:$0 sps:$4 sm:$0xcc]  }
 0xd87   : > { %v1640_v4 = vpop.xlane.xlu1 %1639 }
 0xd88   : > { %3171 = vrcp.f32 %v1640_v4  ;;  %v2021_v4 = vrot.slane %v3136_v2, 2 }
 0xd8b   : > { %v1748_v7 = vpop.permute.xlu1 %1747 }
 0xd8c   : > { %v1753_v9 = vsel %vm775_vm2, %v1748_v7, 0 }
 0xd92   : > { %v3172_v5 = vpop.eup %3171 }
 0xd93   : > { %v1642_v6 = vmul.f32 %v3172_v5, %v3170_v59  ;;  %v2026_v5 = vsel %vm1007_vm5, %v2021_v4, 0 }
 0xd95   : > { %v1643_v8 = vpack.c.bf16 %v1642_v6, %v1642_v6 }
 0xd97   : > { %2908 = vmatmul.mubr.msk.bf16.vlgmr.msra.gmra.mrb[32].mxu1 %vm823_vm3, %v1643_v8 }
 0xd98   : > { %2918 = vmatpush3.bf16.xpose.msra.mxu1 %v1753_v9  ;;  %2919 = vmatprep.mubr.msk.bf16.mxu1 %vm3475_vm0, %v3474_v0 }
 0xd99   : > { %2929 = vmatprep.subr.bf16.mxu1 %v3474_v0 }
 0xd9f   : > { %2920 = vmatmul.mubr.msk.bf16.vlgmr.msra.gmra.mrb[36].mxu1 %vm775_vm2, %v1746_v11 }
 0xda0   : > { %2931 = vmatprep.mubr.msk.bf16.mxu1 %vm3475_vm0, %v3474_v0  ;;  %2930 = vmatpush3.bf16.msra.mxu1 %v1862_v46 }
 0xda1   : > { %2941 = vmatprep.subr.bf16.mxu1 %v3474_v0 }
 0xe6a   : > { %v1686_v15 = vpop.f32.mrb[32].mxu1 }
 0xe6b   : > { %v1692_v16 = vpack.c.bf16 %v1686_v15, %v1686_v15  ;;  %v2909_v17 = vpop.f32.mrb[33].mxu1 }
 0xe6c   : > { %v1689_v18 = vpop.f32.mrb[34].mxu1 }
 0xe6d   : > { %v2910_v19 = vpop.f32.mrb[35].mxu1  ;;  %2914 = vmatmul.mubr.msk.bf16.vlgmr.msra.gmra.mrb[36].mxu0 %vm775_vm2, %v1692_v16 }
 0xe6e   : > { %2925 = vmatprep.mubr.msk.bf16.mxu0 %vm3475_vm0, %v3474_v0 }
 0xe72   : > { %v1789_v20 = vpop.f32.mrb[36].mxu1 }
 0xe73   : > { %v1795_v21 = vmul.f32 0.5, %v1789_v20  ;;  %v2921_v22 = vpop.f32.mrb[37].mxu1 }
 0xe74   : > { %v1792_v23 = vpop.f32.mrb[38].mxu1 }
 0xe75   : > { %v2922_v24 = vpop.f32.mrb[39].mxu1  ;;  %v1796_v25 = vsel %vm823_vm3, %v1795_v21, -inf }
 0xe76   : > { %1797 = vmax.xlane.f32.xlu1 %v1796_v25 }
 0xe87   : > { %1907 = vrot.lane.b32.xlu1 %v3865_v10, %s3495_s23 }
 0xe8b   : > { %1905 = vrot.lane.b32.xlu1 %v3865_v10, %s3496_s25  ;;  %s4237_s25 = sld [smem:[#allocation35_spill]] }
 0xf03   : > { %v1798_v26 = vpop.xlane.xlu1 %1797 }
 0xf04   : > { %v1799_v27 = vsub.f32 %v1795_v21, %v1798_v26  ;;  %v2704_v21 = vld [vmem:[%s4163_s4] ss:$0 sm:$0xff] }
 0xf06   : > { %v1800_v28 = vmul.f32 1.442695, %v1799_v27 }
 0xf07   : > { %v1908_v41 = vpop.permute.xlu1 %1907 }
 0xf08   : > { %3173 = vpow2.f32 %v1800_v28  ;;  %v1913_v43 = vsel %vm775_vm2, %v1908_v41, 0  ;;  %v2705_v41 = vld [vmem:[#allocation7] ss:$0 sm:$0xff] }
 0xf0b   : > { %v1906_v44 = vpop.permute.xlu1 %1905 }
 0xf12   : > { %v3174_v29 = vpop.eup %3173 }
 0xf13   : > { %v1802_v30 = vsel %vm823_vm3, %v3174_v29, 0.0 }
 0xf14   : > { %1803 = vadd.xlane.f32.xlu0 %v1802_v30 }
 0xf2a   : > { %1808 = vrot.lane.b32.xlu0 %v3865_v10, %s3497_s29  ;;  %s4117_s29 = scalar_lea.hbm %s4237_s25, %s2731_s19 }
 0xf40   : > { %v1738_v31 = vpop.f32.mrb[36].mxu0 }
 0xf41   : > { %v1744_v32 = vadd.f32 %v1738_v31, %v1580_v62  ;;  %v2915_v33 = vpop.f32.mrb[37].mxu0 }
 0xf42   : > { %v1741_v34 = vpop.f32.mrb[38].mxu0 }
 0xf43   : > { %v2916_v35 = vpop.f32.mrb[39].mxu0  ;;  %v3137_v34 = vld [vmem:[#allocation11] sm:$0xff]  }
 0xf44   : > { %v3138_v35 = vld [vmem:[#allocation11 + $0x8] sm:$0xff]  }
 0xfa1   : > { %v1804_v36 = vpop.xlane.xlu0 %1803 }
 0xfa2   : > { %3175 = vrcp.f32 %v1804_v36  ;;  %v3140_v36 = vld [vmem:[%s4169_s10 + $0x8] sm:$0xff]  }
 0xfa5   : > { %v1809_v37 = vpop.permute.xlu0 %1808 }
 0xfa6   : > { %v1814_v38 = vsel %vm841_vm4, %v1809_v37, 0 }
 0xfa7   : > { %2924 = vmatpush3.bf16.msra.mxu0 %v1814_v38 }
 0xfa8   : > { %2935 = vmatprep.subr.bf16.mxu0 %v3474_v0 }
 0xfac   : > { %v3176_v39 = vpop.eup %3175 }
 0xfad   : > { %v1806_v40 = vmul.f32 %v3176_v39, %v3174_v29 }
 0xfaf   : > { %v1807_v42 = vpack.c.bf16 %v1806_v40, %v1806_v40 }
 0xfb1   : > { %2926 = vmatmul.mubr.msk.bf16.vlgmr.msra.gmra.mrb[40].mxu0 %vm823_vm3, %v1807_v42 }
 0xfb2   : > { %2936 = vmatpush3.bf16.xpose.msra.mxu0 %v1913_v43  ;;  %2937 = vmatprep.mubr.msk.bf16.mxu0 %vm3475_vm0, %v3474_v0  ;;  %v2706_v43 = vld [vmem:[#allocation8] ss:$0 sm:$0xff] }
 0xfb3   : > { %2947 = vmatprep.subr.bf16.mxu0 %v3474_v0 }
 0xfb9   : > { %2938 = vmatmul.mubr.msk.bf16.vlgmr.msra.gmra.mrb[44].mxu0 %vm775_vm2, %v1906_v44 }
 0xfba   : > { %2949 = vmatprep.mubr.msk.bf16.mxu0 %vm3475_vm0, %v3474_v0  ;;  %2948 = vmatpush3.bf16.msra.mxu0 %v2026_v5 }
 0xfbb   : > { %2961 = vmatprep.subr.bf16.mxu0 %v3474_v0 }
0x1084   : > { %v1850_v47 = vpop.f32.mrb[40].mxu0 }
0x1085   : > { %v1856_v48 = vpack.c.bf16 %v1850_v47, %v1850_v47  ;;  %v2927_v49 = vpop.f32.mrb[41].mxu0 }
0x1086   : > { %v1853_v50 = vpop.f32.mrb[42].mxu0  ;;  %v3141_v49 = vld [vmem:[%s4169_s10 + $0x10] sm:$0xff]  }
0x1087   : > { %v2928_v51 = vpop.f32.mrb[43].mxu0  ;;  %2932 = vmatmul.mubr.msk.bf16.vlgmr.msra.gmra.mrb[40].mxu1 %vm775_vm2, %v1856_v48  ;;  %v3142_v50 = vld [vmem:[%s4169_s10 + $0x18] sm:$0xff]  }
0x1088   : > { %2943 = vmatprep.mubr.msk.bf16.mxu1 %vm3475_vm0, %v3474_v0  ;;  %v2708_v51 = vld [vmem:[#allocation13] ss:$0 sm:$0xff] }
0x108c   : > { %v1949_v52 = vpop.f32.mrb[44].mxu0 }
0x108d   : > { %v1955_v53 = vmul.f32 0.5, %v1949_v52  ;;  %v2939_v54 = vpop.f32.mrb[45].mxu0 }
0x108e   : > { %v1952_v55 = vpop.f32.mrb[46].mxu0 }
0x108f   : > { %v2940_v56 = vpop.f32.mrb[47].mxu0  ;;  %v1956_v57 = vsel %vm823_vm3, %v1955_v53, -inf }
0x1090   : > { %1957 = vmax.xlane.f32.xlu0 %v1956_v57 }
0x10a6   : > { %1968 = vrot.lane.b32.xlu0 %v3865_v10, %s3498_s17  ;;  %s686_s17 = sand.u32 1, %s3455_s30  }
0x10a7   : > { %s4077_s28 = sshll.u32 %s686_s17, 3  ;;  %s2486_s6 = scalar_lea.sflag [#allocation4], %s686_s17 }
0x10a8   : > { %s688_s20 = scalar_lea.vmem [#allocation14], %s4077_s28 }
0x10a9   : > { %s2502_s16 = sshll.u32 %s688_s20, 4  ;;  %s2503_s16 = int_to_ptr.vmem [resolvable:$true] %s2502_s16 }
0x10aa   : > { %s3385_s24 = scalar_lea.vmem %s2503_s16, 128 }
0x10ab   : > { %p3386_p13 = scmp.ne.s32.totalorder %s2503_s16, %s3385_s24 }
0x111d   : > { %v1958_v58 = vpop.xlane.xlu0 %1957 }
0x111e   : > { %v1959_v59 = vsub.f32 %v1955_v53, %v1958_v58 }
0x1120   : > { %v1960_v60 = vmul.f32 1.442695, %v1959_v59  ;;  %v2712_v59 = vld [vmem:[%s4170_s11] ss:$0 sm:$0xff] }
0x1121   : > { %v1969_v61 = vpop.permute.xlu0 %1968 }
0x1122   : > { %3177 = vpow2.f32 %v1960_v60  ;;  %v1974_v62 = vsel %vm841_vm4, %v1969_v61, 0 }
0x1123   : > { %2942 = vmatpush3.bf16.msra.mxu1 %v1974_v62 }
0x1124   : > { %2953 = vmatprep.subr.bf16.mxu1 %v3474_v0 }
0x112c   : > { %v3178_v63 = vpop.eup %3177 }
0x112d   : > { %v1962_v1 = vsel %vm823_vm3, %v3178_v63, 0.0 }
0x112e   : > { %1963 = vadd.xlane.f32.xlu1 %v1962_v1 }
0x115a   : > { %v1898_v10 = vpop.f32.mrb[40].mxu1 }
0x115b   : > { %v1904_v6 = vadd.f32 %v1898_v10, %v1744_v32  ;;  %v2933_v7 = vpop.f32.mrb[41].mxu1 }
0x115c   : > { %v1901_v8 = vpop.f32.mrb[42].mxu1 }
0x115d   : > { %v2934_v9 = vpop.f32.mrb[43].mxu1 }
0x11bb   : > { %v1964_v11 = vpop.xlane.xlu1 %1963 }
0x11bc   : > { %3179 = vrcp.f32 %v1964_v11 }
0x11c6   : > { %v3180_v12 = vpop.eup %3179 }
0x11c7   : > { %v1966_v13 = vmul.f32 %v3180_v12, %v3178_v63 }
0x11c9   : > { %v1967_v14 = vpack.c.bf16 %v1966_v13, %v1966_v13 }
0x11cb   : > { %2944 = vmatmul.mubr.msk.bf16.vlgmr.msra.gmra.mrb[44].mxu1 %vm823_vm3, %v1967_v14 }
0x11cc   : > { %2957 = vmatprep.mubr.msk.bf16.mxu1 %vm3475_vm0, %v3474_v0  ;;  %2954 = vmatpush3.bf16.msra.mxu1 %v3137_v34 }
0x11cd   : > { %2955 = vmatprep.subr.bf16.mxu1 %v3474_v0 }
0x11d0   : > { %2956 = vmatpush3.bf16.msra.mxu1 %v3138_v35 }
0x11d1   : > { %2973 = vmatprep.subr.bf16.mxu1 %v3474_v0 }
0x129e   : > { %v2010_v15 = vpop.f32.mrb[44].mxu1 }
0x129f   : > { %v2016_v16 = vpack.c.bf16 %v2010_v15, %v2010_v15  ;;  %v2945_v17 = vpop.f32.mrb[45].mxu1 }
0x12a0   : > { %v2013_v18 = vpop.f32.mrb[46].mxu1  ;;  %v3144_v17 = vld [vmem:[%s4173_s14 + $0x8] sm:$0xff]  }
0x12a1   : > { %v2946_v19 = vpop.f32.mrb[47].mxu1  ;;  %2950 = vmatmul.mubr.msk.bf16.vlgmr.msra.gmra.mrb[48].mxu0 %vm775_vm2, %v2016_v16  ;;  %v3143_v16 = vld [vmem:[%s4173_s14] sm:$0xff]  }
0x12a2   : > { %2969 = vmatprep.mubr.msk.bf16.mxu0 %vm3475_vm0, %v3474_v0 }
0x1374   : > { %v2062_v20 = vpop.f32.mrb[48].mxu0 }
0x1375   : > { %v2068_v22 = vadd.f32 %v2062_v20, %v1904_v6  ;;  %v2951_v23 = vpop.f32.mrb[49].mxu0 }
0x1376   : > { %v2065_v24 = vpop.f32.mrb[50].mxu0 }
0x1377   : > { %v2076_v25 = vadd.f32 %v2704_v21, %v2068_v22  ;;  %v2952_v26 = vpop.f32.mrb[51].mxu0  ;;  %v2718_v22 = vld [vmem:[%s4171_s12] ss:$0 sm:$0xff] }
0x1378   : > { %v2719_v24 = vld [vmem:[%s4172_s13] ss:$0 sm:$0xff] }
0x1379   : > { %v2077_v27 = vadd.f32 %v2076_v25, %v3853_v3  ;;  %v3139_v3 = vld [vmem:[%s4169_s10] sm:$0xff]  }
0x137a   : > { %2962 = vmatpush3.bf16.msra.mxu0 %v3139_v3 }
0x137b   : > { %v2080_v28 = vsel %vm727_vm1, %v2077_v27, 0.0  ;;  %2963 = vmatprep.subr.bf16.mxu0 %v3474_v0 }
0x137c   : > { %2081 = vadd.xlane.f32.xlu1 %v2080_v28 }
0x137e   : > { %2964 = vmatpush3.bf16.msra.mxu0 %v3140_v36 }
0x137f   : > { %2965 = vmatprep.subr.bf16.mxu0 %v3474_v0 }
0x1382   : > { %2966 = vmatpush3.bf16.msra.mxu0 %v3141_v49 }
0x1383   : > { %2967 = vmatprep.subr.bf16.mxu0 %v3474_v0 }
0x1386   : > { %2968 = vmatpush3.bf16.msra.mxu0 %v3142_v50 }
0x1409   : > { %v2082_v29 = vpop.xlane.xlu1 %2081 }
0x140a   : > { %v2084_v30 = vmul.f32 0.03125, %v2082_v29  ;;  %v3146_v29 = vld [vmem:[%s4233_s2 + $0x8] sm:$0xff]  }
0x140c   : > { %v2085_v31 = vsub.f32 %v2077_v27, %v2084_v30  ;;  %v3145_v27 = vld [vmem:[%s4232_s21] sm:$0xff]   ;;  %v3147_v30 = vld [vmem:[%s4233_s2 + $0x10] sm:$0xff]   ;;  %s4236_s21 = sld [smem:[#allocation25_spill]] }
0x140e   : > { %v2086_v32 = vmul.f32 %v2085_v31, %v2085_v31 }
0x1410   : > { %v2087_v33 = vsel %vm727_vm1, %v2086_v32, 0.0  ;;  %v2720_v32 = vld [vmem:[%s4234_s27] ss:$0 sm:$0xff]  ;;  %s3499_s27 = smov [#allocation14]  }
0x1411   : > { %2088 = vadd.xlane.f32.xlu1 %v2087_v33  ;;  %s3389_s22 = sshll.u32 %s3499_s27, 4  ;;  %s3390_s22 = int_to_ptr.vmem [resolvable:$false] %s3389_s22 }
0x1412   : > { %p4238_p1 = scmp.ne.s32.totalorder %s4236_s21, 0  ;;  %s3391_s1 = scalar_lea.vmem %s3390_s22, 256 }
0x1413   : > { %p3392_p5 = scmp.lt.s32.totalorder %s2503_s16, %s3390_s22  ;;  %p3393_p10 = scmp.lt.s32.totalorder %s3391_s1, %s3385_s24 }
0x1414   : > { %p3387_p6 = pnand %p3386_p13, %p4238_p1 }
0x1415   : > { %p3394_p0 = por %p3393_p10, %p3392_p5 }
0x1416   : > { %p3388_p9 = pneg %p3387_p6 }
0x1418   : > { %p3395_p2 = pnand %p3394_p0, %p3388_p9 }
0x149e   : > { %v2089_v37 = vpop.xlane.xlu1 %2088 }
0x149f   : > { %v2090_v38 = vmul.f32 0.03125, %v2089_v37 }
0x14a1   : > { %v2091_v39 = vadd.f32 1e-05, %v2090_v38 }
0x14a3   : > { %3181 = vrsqrt.f32 %v2091_v39 }
0x14ad   : > { %v3182_v40 = vpop.eup %3181 }
0x14ae   : > { %v2093_v42 = vmul.f32 %v3182_v40, %v2085_v31  ;;  %v3148_v31 = vld [vmem:[%s4233_s2 + $0x18] sm:$0xff]  }
0x14b0   : > { %v2100_v44 = vmul.f32 %v2705_v41, %v2093_v42 }
0x14b2   : > { %v2107_v46 = vadd.f32 %v2706_v43, %v2100_v44 }
0x14b4   : > { %v2115_v47 = vadd.f32 %v2707_v45, %v2107_v46 }
0x14b6   : > { %v2116_v48 = vpack.c.bf16 %v2115_v47, %v2115_v47 }
0x14b8   : > { %2958 = vmatmul.mubr.msk.bf16.vlgmr.msra.gmra.mrb[48].mxu1 %vm727_vm1, %v2116_v48 }
0x14b9   : > { %2977 = vmatprep.mubr.msk.bf16.mxu1 %vm3475_vm0, %v3474_v0  ;;  %2974 = vmatpush3.bf16.msra.mxu1 %v3143_v16 }
0x14ba   : > { %2975 = vmatprep.subr.bf16.mxu1 %v3474_v0 }
0x14bd   : > { %2976 = vmatpush3.bf16.msra.mxu1 %v3144_v17 }
0x14be   : > { %2981 = vmatprep.subr.bf16.mxu1 %v3474_v0 }
0x158b   : > { %v2177_v52 = vpop.f32.mrb[48].mxu1 }
0x158c   : > { %v2178_v53 = vadd.f32 %v2708_v51, %v2177_v52  ;;  %v2959_v54 = vpop.f32.mrb[49].mxu1 }
0x158d   : > { %v2180_v55 = vpop.f32.mrb[50].mxu1 }
0x158e   : > { %v2183_v56 = vmax.f32 %v2178_v53, 0.0  ;;  %v2960_v57 = vpop.f32.mrb[51].mxu1 }
0x1590   : > { %v2184_v58 = vpack.c.bf16 %v2183_v56, %v2183_v56 }
0x1592   : > { %2970 = vmatmul.mubr.msk.bf16.vlgmr.msra.gmra.mrb[52].mxu0 %vm2224_vm6, %v2184_v58 }
0x1665   : > { %v2262_v60 = vpop.f32.mrb[52].mxu0 }
0x1666   : > { %v2263_v61 = vadd.f32 %v2712_v59, %v2262_v60  ;;  %v2971_v62 = vpop.f32.mrb[53].mxu0 }
0x1667   : > { %v2265_v63 = vpop.f32.mrb[54].mxu0 }
0x1668   : > { %v2972_v1 = vpop.f32.mrb[55].mxu0  ;;  %v2268_v2 = vmul.f32 %v2263_v61, %v2263_v61 }
0x166a   : > { %v2269_v4 = vsel %vm727_vm1, %v2268_v2, 0.0 }
0x166b   : > { %2270 = vadd.xlane.f32.xlu1 %v2269_v4 }
0x16f8   : > { %v2271_v5 = vpop.xlane.xlu1 %2270 }
0x16f9   : > { %v2272_v10 = vadd.f32 1e-12, %v2271_v5 }
0x16fb   : > { %3183 = vrsqrt.f32 %v2272_v10 }
0x1705   : > { %v3184_v6 = vpop.eup %3183 }
0x1706   : > { %v2274_v7 = vmul.f32 %v3184_v6, %v2263_v61 }
0x1708   : > { %v2275_v8 = vadd.f32 %v2274_v7, %v2107_v46 }
0x170a   : > { %v2278_v9 = vsel %vm727_vm1, %v2275_v8, 0.0 }
0x170b   : > { %2279 = vadd.xlane.f32.xlu1 %v2278_v9 }
0x1798   : > { %v2280_v11 = vpop.xlane.xlu1 %2279 }
0x1799   : > { %v2281_v12 = vmul.f32 0.03125, %v2280_v11 }
0x179b   : > { %v2282_v13 = vsub.f32 %v2275_v8, %v2281_v12 }
0x179d   : > { %v2283_v14 = vmul.f32 %v2282_v13, %v2282_v13 }
0x179f   : > { %v2284_v15 = vsel %vm727_vm1, %v2283_v14, 0.0 }
0x17a0   : > { %2285 = vadd.xlane.f32.xlu1 %v2284_v15 }
0x182d   : > { %v2286_v18 = vpop.xlane.xlu1 %2285 }
0x182e   : > { %v2287_v19 = vmul.f32 0.03125, %v2286_v18 }
0x1830   : > { %v2288_v20 = vadd.f32 1e-05, %v2287_v19 }
0x1832   : > { %3185 = vrsqrt.f32 %v2288_v20 }
0x183c   : > { %v3186_v21 = vpop.eup %3185 }
0x183d   : > { %v2290_v23 = vmul.f32 %v3186_v21, %v2282_v13 }
0x183f   : > { %v2297_v25 = vmul.f32 %v2718_v22, %v2290_v23 }
0x1841   : > { %v2304_v26 = vadd.f32 %v2719_v24, %v2297_v25 }
0x1843   : > { %v2306_v28 = vpack.c.bf16 %v2304_v26, %v2304_v26  ;;  %2305 = vst.msk [vmem:[%s688_s20] sm:$0xff] %vm727_vm1, %v2304_v26 }
0x1845   : > { %2978 = vmatmul.mubr.msk.bf16.vlgmr.msra.gmra.mrb[52].mxu1 %vm727_vm1, %v2306_v28 }
0x1846   : > { %2982 = vmatpush3.bf16.msra.mxu1 %v3145_v27  ;;  %2989 = vmatprep.mubr.msk.bf16.mxu1 %vm3475_vm0, %v3474_v0 }
0x1847   : > { %2983 = vmatprep.subr.bf16.mxu1 %v3474_v0 }
0x184a   : > { %2984 = vmatpush3.bf16.msra.mxu1 %v3146_v29 }
0x184b   : > { %2985 = vmatprep.subr.bf16.mxu1 %v3474_v0 }
0x184e   : > { %2986 = vmatpush3.bf16.msra.mxu1 %v3147_v30 }
0x184f   : > { %2987 = vmatprep.subr.bf16.mxu1 %v3474_v0  ;;  %v2724_v0 = vld [vmem:[%s4235_s0] ss:$0 sm:$0xff] }
0x1852   : > { %2988 = vmatpush3.bf16.msra.mxu1 %v3148_v31 }
0x1918   : > { %v2367_v33 = vpop.f32.mrb[52].mxu1 }
0x1919   : > { %v2368_v34 = vadd.f32 %v2720_v32, %v2367_v33  ;;  %v2979_v35 = vpop.f32.mrb[53].mxu1 }
0x191a   : > { %v2370_v3 = vpop.f32.mrb[54].mxu1 }
0x191b   : > { %v2373_v36 = vmax.f32 %v2368_v34, 0.0  ;;  %v2980_v37 = vpop.f32.mrb[55].mxu1 }
0x191d   : > { %v2374_v38 = vpack.c.bf16 %v2373_v36, %v2373_v36 }
0x191f   : > { %2990 = vmatmul.mubr.msk.bf16.vlgmr.msra.gmra.mrb[56].mxu1 %vm2224_vm6, %v2374_v38 }
0x19f2   : > { %v2451_v39 = vpop.f32.mrb[56].mxu1 }
0x19f3   : > { %v2452_v40 = vadd.f32 %v2724_v0, %v2451_v39  ;;  %v2991_v41 = vpop.f32.mrb[57].mxu1 }
0x19f4   : > { %v2454_v42 = vpop.f32.mrb[58].mxu1 }
0x19f5   : > { %v2992_v43 = vpop.f32.mrb[59].mxu1  ;;  %v2457_v44 = vmul.f32 %v2452_v40, %v2452_v40  ;;  %v2469_v50 = vand.u32 2147483647, %v2452_v40 }
0x19f7   : > { %v2459_v45 = vsel %vm2458_vm7, %v2457_v44, 0.0 }
0x19f8   : > { %2460 = vadd.xlane.f32.xlu0 %v2459_v45 }
0x1a85   : > { %v2461_v46 = vpop.xlane.xlu0 %2460 }
0x1a86   : > { %3187 = vrsqrt.f32 %v2461_v46  ;;  %vm2464_vm8 = vcmp.eq.f32.partialorder %v2461_v46, inf  ;;  %v2467_v49 = vand.u32 2147483648, %v2461_v46  ;;  %vm2466_vm9 = vcmp.eq.f32.partialorder %v2461_v46, 0.0 }
0x1a90   : > { %v3188_v47 = vpop.eup %3187 }
0x1a91   : > { %v2463_v48 = vmul.f32 %v3188_v47, %v2461_v46 }
0x1a93   : > { %v2465_v51 = vsel %vm2464_vm8, %v2461_v46, %v2463_v48 }
0x1a94   : > { %v2468_v52 = vsel %vm2466_vm9, %v2467_v49, %v2465_v51 }
0x1a95   : > { %v2470_v53 = vadd.f32 %v2469_v50, %v2468_v52 }
0x1a97   : > { %v2472_v54 = vsel %vm2471_vm10, %v2470_v53, 0.0 }
0x1a98   : > { %v2473_v55 = vrot.slane %v2472_v54, 4 }
0x1a99   : > { %3398 = shalt.err (!%p3395_p2)
}
0x1a9a   : > { %s3399_s17 = scalar_lea.hbm %s4117_s29, 128  ;;  %s3403_s15 = scalar_lea.hbm %s4237_s25, 256 }
0x1a9b   : > { %p3400_p3 = scmp.ne.s32.totalorder %s4117_s29, %s3399_s17  ;;  %p3404_p7 = scmp.lt.u32.totalorder %s4117_s29, %s4237_s25 }
0x1a9c   : > { %p3405_p8 = scmp.lt.u32.totalorder %s3403_s15, %s3399_s17  ;;  %p3407_p13 = scmp.lt.u32.totalorder %s3399_s17, %s4117_s29 }
0x1a9d   : > { %p3401_p4 = pnand %p3400_p3, %p4238_p1 }
0x1a9e   : > { %p3406_p11 = por %p3405_p8, %p3404_p7 }
0x1a9f   : > { %p3402_p12 = pneg %p3401_p4 }
0x1aa0   : > { %p3408_p6 = por %p3407_p13, %p3406_p11 }
0x1aa2   : > { %p3409_p9 = pnand %p3408_p6, %p3402_p12 }
0x1aa4   : > { %3412 = shalt.err (!%p3409_p9)
}
0x1aa5   : > { %3021 = dma.vmem_to_hbm [thread:$0]  (%p4238_p1), %s2503_s16, 128, %s4117_s29, %s2486_s6   ;;  %v2474_v56 = vadd.f32 %v2473_v55, %v2472_v54  ;;  %vm2483_vm11 = vcmask 0  }
0x1aa6   : > { %s3500_s26 = smov 125   ;;  %s4239_s27 = sld [smem:[#allocation36_spill]] }
0x1aa7   : > { %v2475_v57 = vrot.slane %v2474_v56, 2 }
0x1aa9   : > { %v2476_v58 = vadd.f32 %v2475_v57, %v2474_v56 }
0x1aab   : > { %v2477_v59 = vrot.slane %v2476_v58, 1 }
0x1aac   : > { %s700_s22 = scalar_lea.vmem %s4239_s27, %s3844_s3 }
0x1aad   : > { %v2478_v60 = vadd.f32 %v2477_v59, %v2476_v58 }
0x1aaf   : > { %2480 = vrot.lane.b32.xlu1 %v2478_v60, %s3500_s26 }
0x1b21   : > { %v2481_v61 = vpop.permute.xlu1 %2480 }
0x1b22   : > { %2484 = vst.msk [vmem:[%s700_s22] sm:$0x1] %vm2483_vm11, %v2481_v61 }
0x1b23 PF: > { %s4240_s1 = sld [smem:[#allocation22_spill]]  ;;  %s4241_s21 = sld [smem:[#allocation20_spill]] }
0x1b24   : > { %s4242_s17 = sld [smem:[#allocation26_spill]] }
0x1b29   : > { %p3063_p5 = scmp.ge.s32.totalorder %s4240_s1, 2  ;;  %s2517_s16 = sand.u32 1, %s4241_s21  }
0x1b2a   : > { %p4243_p1 = scmp.ne.s32.totalorder %s4242_s17, 0  ;;  %s2518_s29 = scalar_lea.sflag [#allocation4], %s2517_s16 }
0x1b2c   : > { %p3046_p10 = pnand %p3063_p5, %p4243_p1 }
0x1b2e   : > { %3446 = dma.done.wait (!%p3046_p10), %s2518_s29, 128  }
0x1b2f   : > { %3448 = vsyncadd (!%p3046_p10), %s2518_s29, 4294967168  ;;  %s4244_s21 = sld [smem:[#allocation23_spill]]  ;;  %s4245_s6 = sld [smem:[#allocation21_spill]] }
0x1b30   : > { %s4246_s20 = sld [smem:[#allocation24_spill]]  ;;  %s4247_s0 = smov %s3455_s30 }
0x1b35   : > { %p34_p0 = scmp.ge.s32.totalorder %s4244_s21, 4   ;;  %s4248_s30 = smov %s4245_s6 }
0x1b37   :  { %36 = sbr.rel (!%p34_p0) target bundleno = 18 (0x12), region = 168 }
0x1b3e   :  { %2529 = vsyncpa [#allocation3], 1 }
0x1b3f   :  { %2531 = vsyncpa [#allocation3 + $0x1], 1 }
0x1b40   :  { %2532 = vsyncpa [#allocation6], 1 }
0x1b41   :  { %2533 = vsyncpa [#allocation9], 1 }
0x1b42   :  { %2534 = vsyncpa [#allocation12], 1 }
0x1b43   :  { %2535 = vsyncpa [#allocation4], 1 }
0x1b44   :  { %2537 = vsyncpa [#allocation4 + $0x1], 1 }

</bundles_post_ra>
